<compile_context>
chip_gen: v6e
topology: v6e:2x2x1
jax: 0.10.0
libtpu: 0.0.40
codegen_flags: <defaults>
</compile_context>

<pallas_src>
import functools
import math

import jax
import jax.numpy as jnp
from jax.experimental import pallas as pl
from jax.experimental.pallas import tpu as pltpu
from jax.tree_util import register_pytree_node_class


_VMEM_LIMIT = 32 * 1024 * 1024  # safe on v5e/v6e (128 MiB phys) and v7x (64 MiB)


# ----------------------------------------------------------------------------
# Small helpers
# ----------------------------------------------------------------------------
def _round_up(x, m):
    return (x + m - 1) // m * m


def _pick_tile(dim, candidates):
    for c in candidates:
        if dim % c == 0:
            return c
    return dim  # fall back to the full (un-tiled) dimension


def _pad_row(v, np_):
    """(C,) -> (1, Np) f32 row, zero padded to the packed channel width."""
    v = v.astype(jnp.float32).reshape(1, -1)
    return jnp.pad(v, ((0, 0), (0, np_ - v.shape[1])))


# ----------------------------------------------------------------------------
# Pallas kernels
# ----------------------------------------------------------------------------
def _mm_kernel(a_ref, b_ref, s_ref, t_ref, o_ref, acc_ref, *, relu):
    """Tiled GEMM with fused per-output-channel scale/shift (+ReLU) epilogue."""
    @pl.when(pl.program_id(2) == 0)
    def _():
        acc_ref[...] = jnp.zeros_like(acc_ref)

    acc_ref[...] += jnp.dot(a_ref[...], b_ref[...],
                            preferred_element_type=jnp.float32)

    @pl.when(pl.program_id(2) == pl.num_programs(2) - 1)
    def _():
        y = acc_ref[...] * s_ref[...] + t_ref[...]
        if relu:
            y = jnp.maximum(y, 0.0)
        o_ref[...] = y.astype(o_ref.dtype)


def matmul_fused(a, b, scale_row, shift_row, relu=False):
    """(Mp, Kp) bf16 @ (Kp, Np) bf16 -> (Mp, Np) f32, epilogue y*s + t (+ReLU).

    Mp must be a multiple of 16, Kp/Np multiples of 128 (lane dense).
    """
    mp, kp = a.shape
    kp2, np_ = b.shape
    assert kp == kp2 and mp % 16 == 0 and kp % 128 == 0 and np_ % 128 == 0

    tm = _pick_tile(mp, (256, 128, 64, 32, 16))
    tn = _pick_tile(np_, (512, 256, 128))
    tk = _pick_tile(kp, (2048, 1024, 768, 640, 512, 384, 256, 128))

    return pl.pallas_call(
        functools.partial(_mm_kernel, relu=relu),
        out_shape=jax.ShapeDtypeStruct((mp, np_), jnp.float32),
        grid_spec=pltpu.PrefetchScalarGridSpec(
            num_scalar_prefetch=0,
            grid=(mp // tm, np_ // tn, kp // tk),
            in_specs=[pl.BlockSpec((tm, tk), lambda i, j, k: (i, k)),
                      pl.BlockSpec((tk, tn), lambda i, j, k: (k, j)),
                      pl.BlockSpec((1, tn), lambda i, j, k: (0, j)),
                      pl.BlockSpec((1, tn), lambda i, j, k: (0, j))],
            out_specs=pl.BlockSpec((tm, tn), lambda i, j, k: (i, j)),
            scratch_shapes=[pltpu.VMEM((tm, tn), jnp.float32)]),
        compiler_params=pltpu.CompilerParams(
            dimension_semantics=("parallel", "parallel", "arbitrary"),
            vmem_limit_bytes=_VMEM_LIMIT),
    )(a, b, scale_row, shift_row)


def _affine_kernel(x_ref, s_ref, t_ref, o_ref, *, relu):
    y = x_ref[...] * s_ref[...] + t_ref[...]
    if relu:
        y = jnp.maximum(y, 0.0)
    o_ref[...] = y


def _affine_res_kernel(x_ref, s_ref, t_ref, r_ref, o_ref, *, relu):
    y = x_ref[...] * s_ref[...] + t_ref[...] + r_ref[...]
    if relu:
        y = jnp.maximum(y, 0.0)
    o_ref[...] = y


def affine_rows(x2d, scale_row, shift_row, residual=None, relu=False):
    """Row-tiled fused y = x*scale + shift (+residual) (+ReLU) on a (M, C) slab."""
    m, c = x2d.shape
    tr = _pick_tile(m, (512, 256, 128, 64, 32, 16, 8))

    in_specs = [pl.BlockSpec((tr, c), lambda i: (i, 0)),
                pl.BlockSpec((1, c), lambda i: (0, 0)),
                pl.BlockSpec((1, c), lambda i: (0, 0))]
    args = [x2d, scale_row, shift_row]
    if residual is not None:
        in_specs.append(pl.BlockSpec((tr, c), lambda i: (i, 0)))
        args.append(residual)
        kern = functools.partial(_affine_res_kernel, relu=relu)
    else:
        kern = functools.partial(_affine_kernel, relu=relu)

    return pl.pallas_call(
        kern,
        out_shape=jax.ShapeDtypeStruct((m, c), x2d.dtype),
        grid_spec=pltpu.PrefetchScalarGridSpec(
            num_scalar_prefetch=0,
            grid=(m // tr,),
            in_specs=in_specs,
            out_specs=pl.BlockSpec((tr, c), lambda i: (i, 0))),
        compiler_params=pltpu.CompilerParams(
            dimension_semantics=("parallel",),
            vmem_limit_bytes=_VMEM_LIMIT),
    )(*args)


# ----------------------------------------------------------------------------
# Packed conv weights (static meta kept out of the traced pytree leaves)
# ----------------------------------------------------------------------------
@register_pytree_node_class
class PackedConv:
    """Conv weight pre-packed as a lane-dense (Kp, Np) bf16 GEMM matrix."""

    def __init__(self, w, kh, kw, cin, cout):
        self.w = w
        self.kh, self.kw, self.cin, self.cout = kh, kw, cin, cout

    def tree_flatten(self):
        return (self.w,), (self.kh, self.kw, self.cin, self.cout)

    @classmethod
    def tree_unflatten(cls, aux, children):
        return cls(children[0], *aux)


def pack_conv(w_hwio):
    kh, kw, cin, cout = w_hwio.shape
    k = kh * kw * cin
    kp, np_ = _round_up(k, 128), _round_up(cout, 128)
    wm = jnp.pad(w_hwio.reshape(k, cout).astype(jnp.bfloat16),
                 ((0, kp - k), (0, np_ - cout)))
    return PackedConv(wm, kh, kw, cin, cout)


# ----------------------------------------------------------------------------
# NN building blocks (conv = im2col glue + fused Pallas GEMM)
# ----------------------------------------------------------------------------
def _conv_gemm(x, pc, stride, scale_row, shift_row, relu):
    """Returns the padded (Mp, Np) f32 GEMM output plus output geometry."""
    n, h, w, ci = x.shape
    assert ci == pc.cin
    kh, kw = pc.kh, pc.kw
    pad = kh // 2
    ho = (h + 2 * pad - kh) // stride + 1
    wo = (w + 2 * pad - kw) // stride + 1
    m = n * ho * wo
    kp, np_ = pc.w.shape
    mp = _round_up(m, 16)

    if kh == 1 and kw == 1 and stride == 1:
        a = x.reshape(m, ci)                       # 1x1 conv: no im2col copy
    else:
        xp = jnp.pad(x, ((0, 0), (pad, pad), (pad, pad), (0, 0))) if pad else x
        cols = []
        for ki in range(kh):
            for kj in range(kw):
                cols.append(xp[:, ki:ki + stride * (ho - 1) + 1:stride,
                               kj:kj + stride * (wo - 1) + 1:stride, :])
        a = jnp.concatenate(cols, axis=-1).reshape(m, kh * kw * ci)

    k = a.shape[1]
    a = jnp.pad(a.astype(jnp.bfloat16), ((0, mp - m), (0, kp - k)))
    y = matmul_fused(a, pc.w, scale_row, shift_row, relu=relu)
    return y, n, ho, wo, m


def conv2d(x, pc, *, stride=1, bias=None, relu=False):
    """Conv (+bias +ReLU fused into the GEMM epilogue), returns NHWC."""
    _, np_ = pc.w.shape
    scale_row = jnp.ones((1, np_), jnp.float32)
    shift_row = jnp.zeros((1, np_), jnp.float32) if bias is None else _pad_row(bias, np_)
    y, n, ho, wo, m = _conv_gemm(x, pc, stride, scale_row, shift_row, relu)
    return y[:m, :pc.cout].reshape(n, ho, wo, pc.cout)


def conv_bn(x, pc, bn, *, stride=1, relu=True, residual=None, eps=1e-5):
    """Conv -> BatchNorm (batch stats) [-> +residual] [-> ReLU].

    The normalize/add/ReLU is a single tiled Pallas affine pass; the no-residual
    path runs it on the lane-dense padded (Mp, Np) GEMM slab before slicing.
    """
    kp, np_ = pc.w.shape
    one = jnp.ones((1, np_), jnp.float32)
    zero = jnp.zeros((1, np_), jnp.float32)
    y, n, ho, wo, m = _conv_gemm(x, pc, stride, one, zero, False)
    c = pc.cout

    yv = y[:m, :c]
    mean = jnp.mean(yv, axis=0)
    var = jnp.mean(jnp.square(yv - mean), axis=0)
    scale = bn["gamma"] * jax.lax.rsqrt(var + eps)
    shift = bn["beta"] - mean * scale

    if residual is None:
        out = affine_rows(y, _pad_row(scale, np_), _pad_row(shift, np_), relu=relu)
        return out[:m, :c].reshape(n, ho, wo, c)

    r = residual.reshape(m, c)
    out = affine_rows(yv, scale.reshape(1, c), shift.reshape(1, c),
                      residual=r, relu=relu)
    return out.reshape(n, ho, wo, c)


def maxpool_3x3_s2(x):
    n, h, w, c = x.shape
    xp = jnp.pad(x, ((0, 0), (1, 1), (1, 1), (0, 0)), constant_values=-jnp.inf)
    ho = (h + 2 - 3) // 2 + 1
    wo = (w + 2 - 3) // 2 + 1
    out = None
    for ki in range(3):
        for kj in range(3):
            s = xp[:, ki:ki + 2 * (ho - 1) + 1:2, kj:kj + 2 * (wo - 1) + 1:2, :]
            out = s if out is None else jnp.maximum(out, s)
    return out


def avgpool_3x3(x, stride):
    # AvgPool2d(kernel=3, stride=stride, padding=1), count_include_pad=True
    n, h, w, c = x.shape
    xp = jnp.pad(x, ((0, 0), (1, 1), (1, 1), (0, 0)))
    ho = (h + 2 - 3) // stride + 1
    wo = (w + 2 - 3) // stride + 1
    acc = None
    for ki in range(3):
        for kj in range(3):
            s = xp[:, ki:ki + stride * (ho - 1) + 1:stride,
                   kj:kj + stride * (wo - 1) + 1:stride, :]
            acc = s if acc is None else acc + s
    return acc / 9.0


def avgpool_downsample(x, stride):
    # AvgPool2d(kernel=stride, stride=stride, ceil_mode=True, count_include_pad=False)
    if stride == 1:
        return x
    n, h, w, c = x.shape
    # TODO(synk): requires H, W divisible by stride (true for the sizes used here).
    return x.reshape(n, h // stride, stride, w // stride, stride, c).mean(axis=(2, 4))


def pixel_shuffle(x, r):
    n, h, w, c = x.shape
    co = c // (r * r)
    y = x.reshape(n, h, w, co, r, r)
    y = jnp.transpose(y, (0, 1, 4, 2, 5, 3))       # N, H, r, W, r, Co
    return y.reshape(n, h * r, w * r, co)


# ----------------------------------------------------------------------------
# Modules
# ----------------------------------------------------------------------------
@functools.partial(jax.jit, static_argnames=("stride", "stype"))
def bottle2neck(x, p, *, stride, stype):
    scale = 4
    width = p["convs"][0].cout
    residual = x
    out = conv_bn(x, p["conv1"], p["bn1"], relu=True)
    spx = [out[..., i * width:(i + 1) * width] for i in range(scale)]
    pieces = []
    sp = None
    for i in range(scale - 1):
        sp = spx[i] if (i == 0 or stype == "stage") else sp + spx[i]
        sp = conv_bn(sp, p["convs"][i], p["convs_bn"][i], stride=stride, relu=True)
        pieces.append(sp)
    if stype == "normal":
        pieces.append(spx[scale - 1])
    else:
        pieces.append(avgpool_3x3(spx[scale - 1], stride))
    out = jnp.concatenate(pieces, axis=-1)
    if "down" in p:
        r = avgpool_downsample(x, stride)
        residual = conv_bn(r, p["down"], p["down_bn"], relu=False)
    # conv3 -> bn3 -> +residual -> ReLU, all fused into one affine pass
    return conv_bn(out, p["conv3"], p["bn3"], relu=True, residual=residual)


def ca_layer(x, p):
    # tiny (M = batch) GEMMs: plain XLA, not worth a pallas_call
    y = jnp.mean(x, axis=(1, 2))                                  # (N, C)
    y = jnp.maximum(y @ p["ca_w1"] + p["ca_b1"], 0.0)
    y = jax.nn.sigmoid(y @ p["ca_w2"] + p["ca_b2"])
    return x * y[:, None, None, :]


def pa_layer(x, p):
    y = conv2d(x, p["pa_c1"], bias=p["pa_b1"], relu=True)         # (N,H,W,C//8)
    # second projection has output width 1: VPU reduction instead of a padded GEMM
    g = jax.nn.sigmoid(jnp.sum(y * p["pa_w2"][:, 0], axis=-1, keepdims=True)
                       + p["pa_b2"][0])
    return x * g


@jax.jit
def de_block(x, p):
    res = conv2d(x, p["conv1"], bias=p["conv1_b"], relu=True)     # bias+ReLU fused
    res = res + x
    res = conv2d(res, p["conv2"], bias=p["conv2_b"])              # bias fused
    res = ca_layer(res, p)
    res = pa_layer(res, p)
    return res + x


@jax.jit
def stem_forward(x, c1, c1_bn, c2, c2_bn, c3, bn1):
    y = conv_bn(x, c1, c1_bn, stride=2, relu=True)
    y = conv_bn(y, c2, c2_bn, relu=True)
    y = conv_bn(y, c3, bn1, relu=True)
    return maxpool_3x3_s2(y)


def res2net_forward(x, p):
    y = stem_forward(x, p["c1"], p["c1_bn"], p["c2"], p["c2_bn"],
                     p["c3"], p["bn1"])
    for bi, bp in enumerate(p["layer1"]):
        y = bottle2neck(y, bp, stride=1,
                        stype="stage" if bi == 0 else "normal")
    x_layer1 = y
    for bi, bp in enumerate(p["layer2"]):
        y = bottle2neck(y, bp, stride=2 if bi == 0 else 1,
                        stype="stage" if bi == 0 else "normal")
    x_layer2 = y
    for bi, bp in enumerate(p["layer3"]):
        y = bottle2neck(y, bp, stride=2 if bi == 0 else 1,
                        stype="stage" if bi == 0 else "normal")
    return y, x_layer1, x_layer2


def transunet_forward(x, p):
    feat, x_layer1, x_layer2 = res2net_forward(x, p["encoder"])
    y = de_block(feat, p["mid_conv"])                 # 1024 ch
    y = pixel_shuffle(y, 2)                           # 256 ch
    y = de_block(y, p["attention1"])
    y = jnp.concatenate([y, x_layer2], axis=-1)       # 768 ch
    y = pixel_shuffle(y, 2)                           # 192 ch
    y = de_block(y, p["attention2"])
    y = jnp.concatenate([y, x_layer1], axis=-1)       # 448 ch
    y = pixel_shuffle(y, 2)                           # 112 ch
    y = pixel_shuffle(y, 2)                           # 28 ch, full resolution
    # transUnet.tail (Conv2d 28->3) is defined in the module but never used
    # in forward(), so it is intentionally omitted here.
    return y


# ----------------------------------------------------------------------------
# Deterministic synthetic parameters
# ----------------------------------------------------------------------------
class ParamGen:
    def __init__(self, seed=0):
        self._key = jax.random.PRNGKey(seed)

    def _next(self):
        self._key, sub = jax.random.split(self._key)
        return sub

    def conv(self, kh, kw, cin, cout):
        std = math.sqrt(2.0 / (kh * kw * cout))   # kaiming fan_out / relu
        w = std * jax.random.normal(self._next(), (kh, kw, cin, cout), jnp.float32)
        return pack_conv(w)

    def linear(self, cin, cout):
        std = math.sqrt(2.0 / cout)
        return std * jax.random.normal(self._next(), (cin, cout), jnp.float32)

    def bias(self, c):
        return jnp.zeros((c,), jnp.float32)

    def bn(self, c):
        return {"gamma": jnp.ones((c,), jnp.float32),
                "beta": jnp.zeros((c,), jnp.float32)}


def make_block(g, inplanes, planes, has_down, base_width=26, scale=4):
    width = int(math.floor(planes * (base_width / 64.0)))
    b = {"conv1": g.conv(1, 1, inplanes, width * scale),
         "bn1": g.bn(width * scale),
         "convs": [g.conv(3, 3, width, width) for _ in range(scale - 1)],
         "convs_bn": [g.bn(width) for _ in range(scale - 1)],
         "conv3": g.conv(1, 1, width * scale, planes * 4),
         "bn3": g.bn(planes * 4)}
    if has_down:
        b["down"] = g.conv(1, 1, inplanes, planes * 4)
        b["down_bn"] = g.bn(planes * 4)
    return b


def make_deblock(g, dim):
    return {"conv1": g.conv(3, 3, dim, dim), "conv1_b": g.bias(dim),
            "conv2": g.conv(3, 3, dim, dim), "conv2_b": g.bias(dim),
            "ca_w1": g.linear(dim, dim // 8), "ca_b1": g.bias(dim // 8),
            "ca_w2": g.linear(dim // 8, dim), "ca_b2": g.bias(dim),
            "pa_c1": g.conv(1, 1, dim, dim // 8), "pa_b1": g.bias(dim // 8),
            "pa_w2": g.linear(dim // 8, 1), "pa_b2": g.bias(1)}


def build_params(seed=0):
    g = ParamGen(seed)
    enc = {"c1": g.conv(3, 3, 3, 32), "c1_bn": g.bn(32),
           "c2": g.conv(3, 3, 32, 32), "c2_bn": g.bn(32),
           "c3": g.conv(3, 3, 32, 64), "bn1": g.bn(64)}

    inplanes = 64

    def make_layer(planes, blocks, stride):
        nonlocal inplanes
        has_down = (stride != 1) or (inplanes != planes * 4)
        layer = [make_block(g, inplanes, planes, has_down)]
        inplanes = planes * 4
        for _ in range(1, blocks):
            layer.append(make_block(g, inplanes, planes, False))
        return layer

    enc["layer1"] = make_layer(64, 3, 1)
    enc["layer2"] = make_layer(128, 4, 2)
    enc["layer3"] = make_layer(256, 23, 2)

    # TODO(synk): pretrained res2net101 weights (torch.load) are replaced with
    # deterministic kaiming-style random init.
    return {"encoder": enc,
            "mid_conv": make_deblock(g, 1024),
            "attention1": make_deblock(g, 256),
            "attention2": make_deblock(g, 192)}


# ----------------------------------------------------------------------------
if __name__ == "__main__":
    key = jax.random.PRNGKey(0)
    # PyTorch-style NCHW input (2, 3, 32, 32); spatial must be divisible by 16.
    x_nchw = jax.random.normal(key, (2, 3, 32, 32), jnp.float32)
    x_nhwc = jnp.transpose(x_nchw, (0, 2, 3, 1))

    params = build_params(seed=0)
    out = transunet_forward(x_nhwc, params)
    out = jax.block_until_ready(out)

    assert out.shape == (2, 32, 32, 28), out.shape
    assert bool(jnp.all(jnp.isfinite(out)))
    print("KERNEL_OK")
</pallas_src>

<mosaic_0001>
module attributes {stable_mosaic.version = 11 : i64} {
  func.func @_mm_kernel(%arg0: i32, %arg1: i32, %arg2: i32, %arg3: memref<256x128xbf16, #tpu.memory_space<vmem>>, %arg4: memref<128x128xbf16, #tpu.memory_space<vmem>>, %arg5: memref<1x128xf32, #tpu.memory_space<vmem>>, %arg6: memref<1x128xf32, #tpu.memory_space<vmem>>, %arg7: memref<256x128xf32, #tpu.memory_space<vmem>>, %arg8: memref<256x128xf32, #tpu.memory_space<vmem>>) attributes {dimension_semantics = [#tpu.dimension_semantics<parallel>, #tpu.dimension_semantics<parallel>, #tpu.dimension_semantics<arbitrary>], iteration_bounds = array<i64: 2, 1, 1>, scalar_prefetch = 0 : i64, scratch_operands = 1 : i64, tpu.core_type = #tpu.core_type<tc>, window_params = [{transform_indices = @transform_0, window_bounds = array<i64: 256, 128>}, {transform_indices = @transform_1, window_bounds = array<i64: 128, 128>}, {transform_indices = @transform_2, window_bounds = array<i64: 1, 128>}, {transform_indices = @transform_3, window_bounds = array<i64: 1, 128>}, {transform_indices = @transform_4, window_bounds = array<i64: 256, 128>}]} {
    %c0_i32 = arith.constant 0 : i32
    %0 = arith.cmpi eq, %arg2, %c0_i32 : i32
    %1 = arith.extui %0 : i1 to i32
    %c0_i32_0 = arith.constant 0 : i32
    %2 = arith.cmpi ne, %1, %c0_i32_0 : i32
    scf.if %2 {
      %cst_10 = arith.constant 0.000000e+00 : f32
      %12 = vector.broadcast %cst_10 : f32 to vector<256x128xf32>
      %c0_11 = arith.constant 0 : index
      %c0_12 = arith.constant 0 : index
      %13 = vector.load %arg8[%c0_11, %c0_12] : memref<256x128xf32, #tpu.memory_space<vmem>>, vector<256x128xf32>
      tpu.vector_store %arg8[%c0_11, %c0_12], %12 {strides = array<i32>} : memref<256x128xf32, #tpu.memory_space<vmem>>, vector<256x128xf32>,
    } else {
    }
    %c0 = arith.constant 0 : index
    %c0_1 = arith.constant 0 : index
    %3 = vector.load %arg8[%c0, %c0_1] : memref<256x128xf32, #tpu.memory_space<vmem>>, vector<256x128xf32>
    %c0_2 = arith.constant 0 : index
    %c0_3 = arith.constant 0 : index
    %4 = vector.load %arg3[%c0_2, %c0_3] : memref<256x128xbf16, #tpu.memory_space<vmem>>, vector<256x128xbf16>
    %c0_4 = arith.constant 0 : index
    %c0_5 = arith.constant 0 : index
    %5 = vector.load %arg4[%c0_4, %c0_5] : memref<128x128xbf16, #tpu.memory_space<vmem>>, vector<128x128xbf16>
    %cst = arith.constant dense<0.000000e+00> : vector<256x128xf32>
    %6 = tpu.matmul %4, %5, %cst {dimension_numbers = #tpu.dot_dimension_numbers<[1], [0], [0], [1], [0, 0, 1, 1], [], []>} : vector<256x128xbf16>, vector<128x128xbf16>, vector<256x128xf32> -> vector<256x128xf32>
    %7 = arith.addf %3, %6 : vector<256x128xf32>
    %c0_6 = arith.constant 0 : index
    %c0_7 = arith.constant 0 : index
    %8 = vector.load %arg8[%c0_6, %c0_7] : memref<256x128xf32, #tpu.memory_space<vmem>>, vector<256x128xf32>
    tpu.vector_store %arg8[%c0_6, %c0_7], %7 {strides = array<i32>} : memref<256x128xf32, #tpu.memory_space<vmem>>, vector<256x128xf32>,
    %c0_i32_8 = arith.constant 0 : i32
    %9 = arith.cmpi eq, %arg2, %c0_i32_8 : i32
    %10 = arith.extui %9 : i1 to i32
    %c0_i32_9 = arith.constant 0 : i32
    %11 = arith.cmpi ne, %10, %c0_i32_9 : i32
    scf.if %11 {
      %c0_10 = arith.constant 0 : index
      %c0_11 = arith.constant 0 : index
      %12 = vector.load %arg8[%c0_10, %c0_11] : memref<256x128xf32, #tpu.memory_space<vmem>>, vector<256x128xf32>
      %c0_12 = arith.constant 0 : index
      %c0_13 = arith.constant 0 : index
      %13 = vector.load %arg5[%c0_12, %c0_13] : memref<1x128xf32, #tpu.memory_space<vmem>>, vector<1x128xf32>
      %14 = vector.broadcast %13 : vector<1x128xf32> to vector<256x128xf32>
      %15 = arith.mulf %12, %14 : vector<256x128xf32>
      %c0_14 = arith.constant 0 : index
      %c0_15 = arith.constant 0 : index
      %16 = vector.load %arg6[%c0_14, %c0_15] : memref<1x128xf32, #tpu.memory_space<vmem>>, vector<1x128xf32>
      %17 = vector.broadcast %16 : vector<1x128xf32> to vector<256x128xf32>
      %18 = arith.addf %15, %17 : vector<256x128xf32>
      %c0_16 = arith.constant 0 : index
      %c0_17 = arith.constant 0 : index
      %19 = vector.load %arg7[%c0_16, %c0_17] : memref<256x128xf32, #tpu.memory_space<vmem>>, vector<256x128xf32>
      tpu.vector_store %arg7[%c0_16, %c0_17], %18 {strides = array<i32>} : memref<256x128xf32, #tpu.memory_space<vmem>>, vector<256x128xf32>,
    } else {
    }
    return
  }
  func.func @transform_0(%arg0: i32, %arg1: i32, %arg2: i32) -> (i32, i32) {
    %c0_i32 = arith.constant 0 : i32
    return %arg0, %arg2 : i32, i32
  }
  func.func @transform_1(%arg0: i32, %arg1: i32, %arg2: i32) -> (i32, i32) {
    %c0_i32 = arith.constant 0 : i32
    return %arg2, %arg1 : i32, i32
  }
  func.func @transform_2(%arg0: i32, %arg1: i32, %arg2: i32) -> (i32, i32) {
    %c0_i32 = arith.constant 0 : i32
    %c0_i32_0 = arith.constant 0 : i32
    return %c0_i32, %arg1 : i32, i32
  }
  func.func @transform_3(%arg0: i32, %arg1: i32, %arg2: i32) -> (i32, i32) {
    %c0_i32 = arith.constant 0 : i32
    %c0_i32_0 = arith.constant 0 : i32
    return %c0_i32, %arg1 : i32, i32
  }
  func.func @transform_4(%arg0: i32, %arg1: i32, %arg2: i32) -> (i32, i32) {
    %c0_i32 = arith.constant 0 : i32
    return %arg0, %arg1 : i32, i32
  }
}

module attributes {stable_mosaic.version = 11 : i64} {
  func.func @_affine_kernel(%arg0: i32, %arg1: memref<512x128xf32, #tpu.memory_space<vmem>>, %arg2: memref<1x128xf32, #tpu.memory_space<vmem>>, %arg3: memref<1x128xf32, #tpu.memory_space<vmem>>, %arg4: memref<512x128xf32, #tpu.memory_space<vmem>>) attributes {dimension_semantics = [#tpu.dimension_semantics<parallel>], iteration_bounds = array<i64: 1>, scalar_prefetch = 0 : i64, scratch_operands = 0 : i64, tpu.core_type = #tpu.core_type<tc>, window_params = [{transform_indices = @transform_0, window_bounds = array<i64: 512, 128>}, {pipeline_mode = #tpu.pipeline_mode<synchronous>, transform_indices = @transform_1, window_bounds = array<i64: 1, 128>}, {pipeline_mode = #tpu.pipeline_mode<synchronous>, transform_indices = @transform_2, window_bounds = array<i64: 1, 128>}, {transform_indices = @transform_3, window_bounds = array<i64: 512, 128>}]} {
    %c0 = arith.constant 0 : index
    %c0_0 = arith.constant 0 : index
    %0 = vector.load %arg1[%c0, %c0_0] : memref<512x128xf32, #tpu.memory_space<vmem>>, vector<512x128xf32>
    %c0_1 = arith.constant 0 : index
    %c0_2 = arith.constant 0 : index
    %1 = vector.load %arg2[%c0_1, %c0_2] : memref<1x128xf32, #tpu.memory_space<vmem>>, vector<1x128xf32>
    %2 = vector.broadcast %1 : vector<1x128xf32> to vector<512x128xf32>
    %3 = arith.mulf %0, %2 : vector<512x128xf32>
    %c0_3 = arith.constant 0 : index
    %c0_4 = arith.constant 0 : index
    %4 = vector.load %arg3[%c0_3, %c0_4] : memref<1x128xf32, #tpu.memory_space<vmem>>, vector<1x128xf32>
    %5 = vector.broadcast %4 : vector<1x128xf32> to vector<512x128xf32>
    %6 = arith.addf %3, %5 : vector<512x128xf32>
    %cst = arith.constant 0.000000e+00 : f32
    %7 = vector.broadcast %cst : f32 to vector<512x128xf32>
    %8 = arith.maximumf %6, %7 : vector<512x128xf32>
    %c0_5 = arith.constant 0 : index
    %c0_6 = arith.constant 0 : index
    %9 = vector.load %arg4[%c0_5, %c0_6] : memref<512x128xf32, #tpu.memory_space<vmem>>, vector<512x128xf32>
    tpu.vector_store %arg4[%c0_5, %c0_6], %8 {strides = array<i32>} : memref<512x128xf32, #tpu.memory_space<vmem>>, vector<512x128xf32>,
    return
  }
  func.func @transform_0(%arg0: i32) -> (i32, i32) {
    %c0_i32 = arith.constant 0 : i32
    %c0_i32_0 = arith.constant 0 : i32
    return %arg0, %c0_i32 : i32, i32
  }
  func.func @transform_1(%arg0: i32) -> (i32, i32) {
    %c0_i32 = arith.constant 0 : i32
    %c0_i32_0 = arith.constant 0 : i32
    %c0_i32_1 = arith.constant 0 : i32
    return %c0_i32, %c0_i32_0 : i32, i32
  }
  func.func @transform_2(%arg0: i32) -> (i32, i32) {
    %c0_i32 = arith.constant 0 : i32
    %c0_i32_0 = arith.constant 0 : i32
    %c0_i32_1 = arith.constant 0 : i32
    return %c0_i32, %c0_i32_0 : i32, i32
  }
  func.func @transform_3(%arg0: i32) -> (i32, i32) {
    %c0_i32 = arith.constant 0 : i32
    %c0_i32_0 = arith.constant 0 : i32
    return %arg0, %c0_i32 : i32, i32
  }
}

module attributes {stable_mosaic.version = 11 : i64} {
  func.func @_mm_kernel(%arg0: i32, %arg1: i32, %arg2: i32, %arg3: memref<256x384xbf16, #tpu.memory_space<vmem>>, %arg4: memref<384x128xbf16, #tpu.memory_space<vmem>>, %arg5: memref<1x128xf32, #tpu.memory_space<vmem>>, %arg6: memref<1x128xf32, #tpu.memory_space<vmem>>, %arg7: memref<256x128xf32, #tpu.memory_space<vmem>>, %arg8: memref<256x128xf32, #tpu.memory_space<vmem>>) attributes {dimension_semantics = [#tpu.dimension_semantics<parallel>, #tpu.dimension_semantics<parallel>, #tpu.dimension_semantics<arbitrary>], iteration_bounds = array<i64: 2, 1, 1>, scalar_prefetch = 0 : i64, scratch_operands = 1 : i64, tpu.core_type = #tpu.core_type<tc>, window_params = [{transform_indices = @transform_0, window_bounds = array<i64: 256, 384>}, {transform_indices = @transform_1, window_bounds = array<i64: 384, 128>}, {transform_indices = @transform_2, window_bounds = array<i64: 1, 128>}, {transform_indices = @transform_3, window_bounds = array<i64: 1, 128>}, {transform_indices = @transform_4, window_bounds = array<i64: 256, 128>}]} {
    %c0_i32 = arith.constant 0 : i32
    %0 = arith.cmpi eq, %arg2, %c0_i32 : i32
    %1 = arith.extui %0 : i1 to i32
    %c0_i32_0 = arith.constant 0 : i32
    %2 = arith.cmpi ne, %1, %c0_i32_0 : i32
    scf.if %2 {
      %cst_10 = arith.constant 0.000000e+00 : f32
      %12 = vector.broadcast %cst_10 : f32 to vector<256x128xf32>
      %c0_11 = arith.constant 0 : index
      %c0_12 = arith.constant 0 : index
      %13 = vector.load %arg8[%c0_11, %c0_12] : memref<256x128xf32, #tpu.memory_space<vmem>>, vector<256x128xf32>
      tpu.vector_store %arg8[%c0_11, %c0_12], %12 {strides = array<i32>} : memref<256x128xf32, #tpu.memory_space<vmem>>, vector<256x128xf32>,
    } else {
    }
    %c0 = arith.constant 0 : index
    %c0_1 = arith.constant 0 : index
    %3 = vector.load %arg8[%c0, %c0_1] : memref<256x128xf32, #tpu.memory_space<vmem>>, vector<256x128xf32>
    %c0_2 = arith.constant 0 : index
    %c0_3 = arith.constant 0 : index
    %4 = vector.load %arg3[%c0_2, %c0_3] : memref<256x384xbf16, #tpu.memory_space<vmem>>, vector<256x384xbf16>
    %c0_4 = arith.constant 0 : index
    %c0_5 = arith.constant 0 : index
    %5 = vector.load %arg4[%c0_4, %c0_5] : memref<384x128xbf16, #tpu.memory_space<vmem>>, vector<384x128xbf16>
    %cst = arith.constant dense<0.000000e+00> : vector<256x128xf32>
    %6 = tpu.matmul %4, %5, %cst {dimension_numbers = #tpu.dot_dimension_numbers<[1], [0], [0], [1], [0, 0, 1, 1], [], []>} : vector<256x384xbf16>, vector<384x128xbf16>, vector<256x128xf32> -> vector<256x128xf32>
    %7 = arith.addf %3, %6 : vector<256x128xf32>
    %c0_6 = arith.constant 0 : index
    %c0_7 = arith.constant 0 : index
    %8 = vector.load %arg8[%c0_6, %c0_7] : memref<256x128xf32, #tpu.memory_space<vmem>>, vector<256x128xf32>
    tpu.vector_store %arg8[%c0_6, %c0_7], %7 {strides = array<i32>} : memref<256x128xf32, #tpu.memory_space<vmem>>, vector<256x128xf32>,
    %c0_i32_8 = arith.constant 0 : i32
    %9 = arith.cmpi eq, %arg2, %c0_i32_8 : i32
    %10 = arith.extui %9 : i1 to i32
    %c0_i32_9 = arith.constant 0 : i32
    %11 = arith.cmpi ne, %10, %c0_i32_9 : i32
    scf.if %11 {
      %c0_10 = arith.constant 0 : index
      %c0_11 = arith.constant 0 : index
      %12 = vector.load %arg8[%c0_10, %c0_11] : memref<256x128xf32, #tpu.memory_space<vmem>>, vector<256x128xf32>
      %c0_12 = arith.constant 0 : index
      %c0_13 = arith.constant 0 : index
      %13 = vector.load %arg5[%c0_12, %c0_13] : memref<1x128xf32, #tpu.memory_space<vmem>>, vector<1x128xf32>
      %14 = vector.broadcast %13 : vector<1x128xf32> to vector<256x128xf32>
      %15 = arith.mulf %12, %14 : vector<256x128xf32>
      %c0_14 = arith.constant 0 : index
      %c0_15 = arith.constant 0 : index
      %16 = vector.load %arg6[%c0_14, %c0_15] : memref<1x128xf32, #tpu.memory_space<vmem>>, vector<1x128xf32>
      %17 = vector.broadcast %16 : vector<1x128xf32> to vector<256x128xf32>
      %18 = arith.addf %15, %17 : vector<256x128xf32>
      %c0_16 = arith.constant 0 : index
      %c0_17 = arith.constant 0 : index
      %19 = vector.load %arg7[%c0_16, %c0_17] : memref<256x128xf32, #tpu.memory_space<vmem>>, vector<256x128xf32>
      tpu.vector_store %arg7[%c0_16, %c0_17], %18 {strides = array<i32>} : memref<256x128xf32, #tpu.memory_space<vmem>>, vector<256x128xf32>,
    } else {
    }
    return
  }
  func.func @transform_0(%arg0: i32, %arg1: i32, %arg2: i32) -> (i32, i32) {
    %c0_i32 = arith.constant 0 : i32
    return %arg0, %arg2 : i32, i32
  }
  func.func @transform_1(%arg0: i32, %arg1: i32, %arg2: i32) -> (i32, i32) {
    %c0_i32 = arith.constant 0 : i32
    return %arg2, %arg1 : i32, i32
  }
  func.func @transform_2(%arg0: i32, %arg1: i32, %arg2: i32) -> (i32, i32) {
    %c0_i32 = arith.constant 0 : i32
    %c0_i32_0 = arith.constant 0 : i32
    return %c0_i32, %arg1 : i32, i32
  }
  func.func @transform_3(%arg0: i32, %arg1: i32, %arg2: i32) -> (i32, i32) {
    %c0_i32 = arith.constant 0 : i32
    %c0_i32_0 = arith.constant 0 : i32
    return %c0_i32, %arg1 : i32, i32
  }
  func.func @transform_4(%arg0: i32, %arg1: i32, %arg2: i32) -> (i32, i32) {
    %c0_i32 = arith.constant 0 : i32
    return %arg0, %arg1 : i32, i32
  }
}

</mosaic_0001>

<bundles_post_ra>
// kernel: stem_forward.7
= control target key start
LH: loop header
LB: loop body
LE: loop exit
PB: predicated region body
PF: predicated region fallthrough
CT: control target
= control target key end

     0   :  { %s896_s0 = inlined_call_operand.vmem [shape: f32[512,128], index: 0, kind: input, shape index: {}]   ;;  %s897_s1 = inlined_call_operand.vmem [shape: f32[1,128], index: 1, kind: input, shape index: {}]   ;;  %s898_s2 = inlined_call_operand.vmem [shape: f32[1,128], index: 2, kind: input, shape index: {}]   ;;  %s899_s3 = inlined_call_operand.vmem [shape: f32[512,128], index: 3, kind: output, shape index: {}]  }
   0x1   :  { %v14_v0 = vld [vmem:[%s896_s0] sm:$0xff]  ;;  %v15_v4 = vld [vmem:[%s896_s0 + $0x8] sm:$0xff]  ;;  %v16_v5 = vld [vmem:[%s896_s0 + $0x10] sm:$0xff] }
   0x2   :  { %v380_v1 = vld [vmem:[%s897_s1] ss:$0 sm:$0xff]  ;;  %v17_v6 = vld [vmem:[%s896_s0 + $0x18] sm:$0xff]  ;;  %v19_v11 = vld [vmem:[%s896_s0 + $0x28] sm:$0xff] }
   0x3   :  { %v385_v2 = vld [vmem:[%s898_s2] ss:$0 sm:$0xff]  ;;  %v85_v3 = vmul.f32 %v380_v1, %v14_v0  ;;  %v86_v7 = vmul.f32 %v380_v1, %v15_v4  ;;  %v87_v8 = vmul.f32 %v380_v1, %v16_v5  ;;  %v88_v9 = vmul.f32 %v380_v1, %v17_v6  ;;  %v20_v12 = vld [vmem:[%s896_s0 + $0x30] sm:$0xff]  ;;  %v21_v17 = vld [vmem:[%s896_s0 + $0x38] sm:$0xff] }
   0x4   :  { %v18_v10 = vld [vmem:[%s896_s0 + $0x20] sm:$0xff]  ;;  %v90_v15 = vmul.f32 %v380_v1, %v19_v11  ;;  %v91_v16 = vmul.f32 %v380_v1, %v20_v12  ;;  %v92_v21 = vmul.f32 %v380_v1, %v21_v17  ;;  %v23_v27 = vld [vmem:[%s896_s0 + $0x48] sm:$0xff]  ;;  %v24_v28 = vld [vmem:[%s896_s0 + $0x50] sm:$0xff] }
   0x5   :  { %v156_v13 = vadd.f32 %v385_v2, %v85_v3  ;;  %v89_v14 = vmul.f32 %v380_v1, %v18_v10  ;;  %v157_v18 = vadd.f32 %v385_v2, %v86_v7  ;;  %v158_v19 = vadd.f32 %v385_v2, %v87_v8  ;;  %v22_v22 = vld [vmem:[%s896_s0 + $0x40] sm:$0xff]  ;;  %v25_v29 = vld [vmem:[%s896_s0 + $0x58] sm:$0xff]  ;;  %v27_v35 = vld [vmem:[%s896_s0 + $0x68] sm:$0xff] }
   0x6   :  { %v159_v20 = vadd.f32 %v385_v2, %v88_v9  ;;  %v161_v25 = vadd.f32 %v385_v2, %v90_v15  ;;  %v162_v26 = vadd.f32 %v385_v2, %v91_v16  ;;  %v163_v33 = vadd.f32 %v385_v2, %v92_v21  ;;  %v26_v34 = vld [vmem:[%s896_s0 + $0x60] sm:$0xff]  ;;  %v28_v36 = vld [vmem:[%s896_s0 + $0x70] sm:$0xff]  ;;  %v29_v41 = vld [vmem:[%s896_s0 + $0x78] sm:$0xff] }
   0x7   :  { %v220_v23 = vmax.f32 %v156_v13, 0.0  ;;  %v160_v24 = vadd.f32 %v385_v2, %v89_v14  ;;  %v221_v30 = vmax.f32 %v157_v18, 0.0  ;;  %v222_v31 = vmax.f32 %v158_v19, 0.0  ;;  %v30_v54 = vld [vmem:[%s896_s0 + $0x80] sm:$0xff]  ;;  %v31_v59 = vld [vmem:[%s896_s0 + $0x88] sm:$0xff]  ;;  %v32_v60 = vld [vmem:[%s896_s0 + $0x90] sm:$0xff] }
   0x8   :  { %v223_v32 = vmax.f32 %v159_v20, 0.0  ;;  %v225_v38 = vmax.f32 %v161_v25, 0.0  ;;  %v226_v39 = vmax.f32 %v162_v26, 0.0  ;;  %v93_v40 = vmul.f32 %v380_v1, %v22_v22  ;;  %v33_v61 = vld [vmem:[%s896_s0 + $0x98] sm:$0xff]  ;;  %v34_v4 = vld [vmem:[%s896_s0 + $0xa0] sm:$0xff]  ;;  %v35_v5 = vld [vmem:[%s896_s0 + $0xa8] sm:$0xff] }
   0x9   :  { %284 = vst [vmem:[%s899_s3] sm:$0xff] %v220_v23  ;;  %v224_v37 = vmax.f32 %v160_v24, 0.0  ;;  %285 = vst [vmem:[%s899_s3 + $0x8] sm:$0xff] %v221_v30  ;;  %v227_v42 = vmax.f32 %v163_v33, 0.0  ;;  %v94_v43 = vmul.f32 %v380_v1, %v23_v27  ;;  %v95_v44 = vmul.f32 %v380_v1, %v24_v28  ;;  %v36_v6 = vld [vmem:[%s896_s0 + $0xb0] sm:$0xff]  ;;  %v37_v11 = vld [vmem:[%s896_s0 + $0xb8] sm:$0xff] }
   0xa   :  { %286 = vst [vmem:[%s899_s3 + $0x10] sm:$0xff] %v222_v31  ;;  %287 = vst [vmem:[%s899_s3 + $0x18] sm:$0xff] %v223_v32  ;;  %v96_v45 = vmul.f32 %v380_v1, %v25_v29  ;;  %v164_v46 = vadd.f32 %v385_v2, %v93_v40  ;;  %v97_v47 = vmul.f32 %v380_v1, %v26_v34  ;;  %v38_v24 = vld [vmem:[%s896_s0 + $0xc0] sm:$0xff]  ;;  %v39_v29 = vld [vmem:[%s896_s0 + $0xc8] sm:$0xff] }
   0xb   :  { %288 = vst [vmem:[%s899_s3 + $0x20] sm:$0xff] %v224_v37  ;;  %289 = vst [vmem:[%s899_s3 + $0x28] sm:$0xff] %v225_v38  ;;  %v98_v48 = vmul.f32 %v380_v1, %v27_v35  ;;  %v99_v49 = vmul.f32 %v380_v1, %v28_v36  ;;  %v165_v50 = vadd.f32 %v385_v2, %v94_v43  ;;  %v40_v30 = vld [vmem:[%s896_s0 + $0xd0] sm:$0xff]  ;;  %v41_v31 = vld [vmem:[%s896_s0 + $0xd8] sm:$0xff] }
   0xc   :  { %290 = vst [vmem:[%s899_s3 + $0x30] sm:$0xff] %v226_v39  ;;  %291 = vst [vmem:[%s899_s3 + $0x38] sm:$0xff] %v227_v42  ;;  %v166_v51 = vadd.f32 %v385_v2, %v95_v44  ;;  %v167_v52 = vadd.f32 %v385_v2, %v96_v45  ;;  %v100_v53 = vmul.f32 %v380_v1, %v29_v41  ;;  %v228_v55 = vmax.f32 %v164_v46, 0.0  ;;  %v42_v36 = vld [vmem:[%s896_s0 + $0xe0] sm:$0xff]  ;;  %v43_v37 = vld [vmem:[%s896_s0 + $0xe8] sm:$0xff] }
   0xd   :  { %v168_v56 = vadd.f32 %v385_v2, %v97_v47  ;;  %v169_v57 = vadd.f32 %v385_v2, %v98_v48  ;;  %v170_v58 = vadd.f32 %v385_v2, %v99_v49  ;;  %v229_v62 = vmax.f32 %v165_v50, 0.0  ;;  %v44_v38 = vld [vmem:[%s896_s0 + $0xf0] sm:$0xff]  ;;  %v45_v43 = vld [vmem:[%s896_s0 + $0xf8] sm:$0xff] }
   0xe   :  { %v230_v63 = vmax.f32 %v166_v51, 0.0  ;;  %v231_v0 = vmax.f32 %v167_v52, 0.0  ;;  %v171_v3 = vadd.f32 %v385_v2, %v100_v53  ;;  %292 = vst [vmem:[%s899_s3 + $0x40] sm:$0xff] %v228_v55  ;;  %v101_v10 = vmul.f32 %v380_v1, %v30_v54 }
   0xf   :  { %v232_v7 = vmax.f32 %v168_v56, 0.0  ;;  %v233_v8 = vmax.f32 %v169_v57, 0.0  ;;  %v234_v9 = vmax.f32 %v170_v58, 0.0  ;;  %293 = vst [vmem:[%s899_s3 + $0x48] sm:$0xff] %v229_v62  ;;  %v102_v13 = vmul.f32 %v380_v1, %v31_v59  ;;  %v46_v56 = vld [vmem:[%s896_s0 + $0x100] sm:$0xff]  ;;  %v48_v62 = vld [vmem:[%s896_s0 + $0x110] sm:$0xff] }
  0x10   :  { %294 = vst [vmem:[%s899_s3 + $0x50] sm:$0xff] %v230_v63  ;;  %295 = vst [vmem:[%s899_s3 + $0x58] sm:$0xff] %v231_v0  ;;  %v235_v12 = vmax.f32 %v171_v3, 0.0  ;;  %v103_v14 = vmul.f32 %v380_v1, %v32_v60  ;;  %v104_v15 = vmul.f32 %v380_v1, %v33_v61  ;;  %v172_v16 = vadd.f32 %v385_v2, %v101_v10  ;;  %v47_v61 = vld [vmem:[%s896_s0 + $0x108] sm:$0xff]  ;;  %v49_v63 = vld [vmem:[%s896_s0 + $0x118] sm:$0xff] }
  0x11   :  { %296 = vst [vmem:[%s899_s3 + $0x60] sm:$0xff] %v232_v7  ;;  %297 = vst [vmem:[%s899_s3 + $0x68] sm:$0xff] %v233_v8  ;;  %v105_v17 = vmul.f32 %v380_v1, %v34_v4  ;;  %v106_v18 = vmul.f32 %v380_v1, %v35_v5  ;;  %v107_v19 = vmul.f32 %v380_v1, %v36_v6  ;;  %v50_v6 = vld [vmem:[%s896_s0 + $0x120] sm:$0xff]  ;;  %v51_v7 = vld [vmem:[%s896_s0 + $0x128] sm:$0xff] }
  0x12   :  { %298 = vst [vmem:[%s899_s3 + $0x70] sm:$0xff] %v234_v9  ;;  %299 = vst [vmem:[%s899_s3 + $0x78] sm:$0xff] %v235_v12  ;;  %v173_v20 = vadd.f32 %v385_v2, %v102_v13  ;;  %v174_v21 = vadd.f32 %v385_v2, %v103_v14  ;;  %v175_v22 = vadd.f32 %v385_v2, %v104_v15  ;;  %v236_v25 = vmax.f32 %v172_v16, 0.0  ;;  %v52_v8 = vld [vmem:[%s896_s0 + $0x130] sm:$0xff]  ;;  %v53_v13 = vld [vmem:[%s896_s0 + $0x138] sm:$0xff] }
  0x13   :  { %v108_v23 = vmul.f32 %v380_v1, %v37_v11  ;;  %v176_v26 = vadd.f32 %v385_v2, %v105_v17  ;;  %v177_v27 = vadd.f32 %v385_v2, %v106_v18  ;;  %v178_v28 = vadd.f32 %v385_v2, %v107_v19 }
  0x14   :  { %v237_v32 = vmax.f32 %v173_v20, 0.0  ;;  %v238_v33 = vmax.f32 %v174_v21, 0.0  ;;  %v239_v34 = vmax.f32 %v175_v22, 0.0  ;;  %300 = vst [vmem:[%s899_s3 + $0x80] sm:$0xff] %v236_v25  ;;  %v109_v42 = vmul.f32 %v380_v1, %v38_v24 }
  0x15   :  { %v179_v35 = vadd.f32 %v385_v2, %v108_v23  ;;  %v240_v39 = vmax.f32 %v176_v26, 0.0  ;;  %v241_v40 = vmax.f32 %v177_v27, 0.0  ;;  %v242_v41 = vmax.f32 %v178_v28, 0.0  ;;  %v54_v26 = vld [vmem:[%s896_s0 + $0x140] sm:$0xff] }
  0x16   :  { %301 = vst [vmem:[%s899_s3 + $0x88] sm:$0xff] %v237_v32  ;;  %302 = vst [vmem:[%s899_s3 + $0x90] sm:$0xff] %v238_v33  ;;  %v110_v45 = vmul.f32 %v380_v1, %v39_v29  ;;  %v111_v46 = vmul.f32 %v380_v1, %v40_v30  ;;  %v112_v47 = vmul.f32 %v380_v1, %v41_v31  ;;  %v55_v31 = vld [vmem:[%s896_s0 + $0x148] sm:$0xff]  ;;  %v56_v32 = vld [vmem:[%s896_s0 + $0x150] sm:$0xff] }
  0x17   :  { %303 = vst [vmem:[%s899_s3 + $0x98] sm:$0xff] %v239_v34  ;;  %v243_v44 = vmax.f32 %v179_v35, 0.0  ;;  %304 = vst [vmem:[%s899_s3 + $0xa0] sm:$0xff] %v240_v39  ;;  %v180_v48 = vadd.f32 %v385_v2, %v109_v42  ;;  %v113_v49 = vmul.f32 %v380_v1, %v42_v36  ;;  %v114_v50 = vmul.f32 %v380_v1, %v43_v37  ;;  %v57_v33 = vld [vmem:[%s896_s0 + $0x158] sm:$0xff]  ;;  %v59_v39 = vld [vmem:[%s896_s0 + $0x168] sm:$0xff] }
  0x18   :  { %305 = vst [vmem:[%s899_s3 + $0xa8] sm:$0xff] %v241_v40  ;;  %306 = vst [vmem:[%s899_s3 + $0xb0] sm:$0xff] %v242_v41  ;;  %v115_v51 = vmul.f32 %v380_v1, %v44_v38  ;;  %v181_v52 = vadd.f32 %v385_v2, %v110_v45  ;;  %v182_v53 = vadd.f32 %v385_v2, %v111_v46  ;;  %v58_v38 = vld [vmem:[%s896_s0 + $0x160] sm:$0xff]  ;;  %v60_v40 = vld [vmem:[%s896_s0 + $0x170] sm:$0xff] }
  0x19   :  { %307 = vst [vmem:[%s899_s3 + $0xb8] sm:$0xff] %v243_v44  ;;  %v183_v54 = vadd.f32 %v385_v2, %v112_v47  ;;  %v116_v55 = vmul.f32 %v380_v1, %v45_v43  ;;  %v244_v57 = vmax.f32 %v180_v48, 0.0  ;;  %v184_v58 = vadd.f32 %v385_v2, %v113_v49  ;;  %v61_v45 = vld [vmem:[%s896_s0 + $0x178] sm:$0xff] }
  0x1a   :  { %v185_v59 = vadd.f32 %v385_v2, %v114_v50  ;;  %v186_v60 = vadd.f32 %v385_v2, %v115_v51  ;;  %v245_v0 = vmax.f32 %v181_v52, 0.0  ;;  %v246_v3 = vmax.f32 %v182_v53, 0.0 }
  0x1b   :  { %v247_v4 = vmax.f32 %v183_v54, 0.0  ;;  %v187_v5 = vadd.f32 %v385_v2, %v116_v55  ;;  %308 = vst [vmem:[%s899_s3 + $0xc0] sm:$0xff] %v244_v57  ;;  %v248_v9 = vmax.f32 %v184_v58, 0.0  ;;  %v117_v12 = vmul.f32 %v380_v1, %v46_v56  ;;  %v62_v58 = vld [vmem:[%s896_s0 + $0x180] sm:$0xff] }
  0x1c   :  { %v249_v10 = vmax.f32 %v185_v59, 0.0  ;;  %v250_v11 = vmax.f32 %v186_v60, 0.0  ;;  %309 = vst [vmem:[%s899_s3 + $0xc8] sm:$0xff] %v245_v0  ;;  %310 = vst [vmem:[%s899_s3 + $0xd0] sm:$0xff] %v246_v3  ;;  %v118_v15 = vmul.f32 %v380_v1, %v47_v61  ;;  %v119_v16 = vmul.f32 %v380_v1, %v48_v62  ;;  %v64_v0 = vld [vmem:[%s896_s0 + $0x190] sm:$0xff]  ;;  %v65_v3 = vld [vmem:[%s896_s0 + $0x198] sm:$0xff] }
  0x1d   :  { %311 = vst [vmem:[%s899_s3 + $0xd8] sm:$0xff] %v247_v4  ;;  %v251_v14 = vmax.f32 %v187_v5, 0.0  ;;  %v120_v17 = vmul.f32 %v380_v1, %v49_v63  ;;  %312 = vst [vmem:[%s899_s3 + $0xe0] sm:$0xff] %v248_v9  ;;  %v188_v18 = vadd.f32 %v385_v2, %v117_v12  ;;  %v121_v19 = vmul.f32 %v380_v1, %v50_v6  ;;  %v63_v63 = vld [vmem:[%s896_s0 + $0x188] sm:$0xff] }
  0x1e   :  { %313 = vst [vmem:[%s899_s3 + $0xe8] sm:$0xff] %v249_v10  ;;  %314 = vst [vmem:[%s899_s3 + $0xf0] sm:$0xff] %v250_v11  ;;  %v122_v20 = vmul.f32 %v380_v1, %v51_v7  ;;  %v123_v21 = vmul.f32 %v380_v1, %v52_v8  ;;  %v189_v22 = vadd.f32 %v385_v2, %v118_v15  ;;  %v66_v8 = vld [vmem:[%s896_s0 + $0x1a0] sm:$0xff]  ;;  %v67_v9 = vld [vmem:[%s896_s0 + $0x1a8] sm:$0xff] }
  0x1f   :  { %315 = vst [vmem:[%s899_s3 + $0xf8] sm:$0xff] %v251_v14  ;;  %v190_v23 = vadd.f32 %v385_v2, %v119_v16  ;;  %v191_v24 = vadd.f32 %v385_v2, %v120_v17  ;;  %v124_v25 = vmul.f32 %v380_v1, %v53_v13  ;;  %v252_v27 = vmax.f32 %v188_v18, 0.0  ;;  %v68_v10 = vld [vmem:[%s896_s0 + $0x1b0] sm:$0xff]  ;;  %v69_v15 = vld [vmem:[%s896_s0 + $0x1b8] sm:$0xff] }
  0x20   :  { %v192_v28 = vadd.f32 %v385_v2, %v121_v19  ;;  %v193_v29 = vadd.f32 %v385_v2, %v122_v20  ;;  %v194_v30 = vadd.f32 %v385_v2, %v123_v21  ;;  %v253_v34 = vmax.f32 %v189_v22, 0.0 }
  0x21   :  { %v254_v35 = vmax.f32 %v190_v23, 0.0  ;;  %v255_v36 = vmax.f32 %v191_v24, 0.0  ;;  %v195_v37 = vadd.f32 %v385_v2, %v124_v25  ;;  %316 = vst [vmem:[%s899_s3 + $0x100] sm:$0xff] %v252_v27  ;;  %v125_v44 = vmul.f32 %v380_v1, %v54_v26 }
  0x22   :  { %v256_v41 = vmax.f32 %v192_v28, 0.0  ;;  %v257_v42 = vmax.f32 %v193_v29, 0.0  ;;  %v258_v43 = vmax.f32 %v194_v30, 0.0  ;;  %317 = vst [vmem:[%s899_s3 + $0x108] sm:$0xff] %v253_v34  ;;  %v126_v47 = vmul.f32 %v380_v1, %v55_v31  ;;  %v70_v28 = vld [vmem:[%s896_s0 + $0x1c0] sm:$0xff]  ;;  %v72_v34 = vld [vmem:[%s896_s0 + $0x1d0] sm:$0xff] }
  0x23   :  { %318 = vst [vmem:[%s899_s3 + $0x110] sm:$0xff] %v254_v35  ;;  %319 = vst [vmem:[%s899_s3 + $0x118] sm:$0xff] %v255_v36  ;;  %v259_v46 = vmax.f32 %v195_v37, 0.0  ;;  %v127_v48 = vmul.f32 %v380_v1, %v56_v32  ;;  %v128_v49 = vmul.f32 %v380_v1, %v57_v33  ;;  %v196_v50 = vadd.f32 %v385_v2, %v125_v44  ;;  %v71_v33 = vld [vmem:[%s896_s0 + $0x1c8] sm:$0xff]  ;;  %v73_v35 = vld [vmem:[%s896_s0 + $0x1d8] sm:$0xff] }
  0x24   :  { %320 = vst [vmem:[%s899_s3 + $0x120] sm:$0xff] %v256_v41  ;;  %321 = vst [vmem:[%s899_s3 + $0x128] sm:$0xff] %v257_v42  ;;  %v129_v51 = vmul.f32 %v380_v1, %v58_v38  ;;  %v130_v52 = vmul.f32 %v380_v1, %v59_v39  ;;  %v131_v53 = vmul.f32 %v380_v1, %v60_v40  ;;  %v74_v40 = vld [vmem:[%s896_s0 + $0x1e0] sm:$0xff]  ;;  %v75_v41 = vld [vmem:[%s896_s0 + $0x1e8] sm:$0xff] }
  0x25   :  { %322 = vst [vmem:[%s899_s3 + $0x130] sm:$0xff] %v258_v43  ;;  %323 = vst [vmem:[%s899_s3 + $0x138] sm:$0xff] %v259_v46  ;;  %v197_v54 = vadd.f32 %v385_v2, %v126_v47  ;;  %v198_v55 = vadd.f32 %v385_v2, %v127_v48  ;;  %v199_v56 = vadd.f32 %v385_v2, %v128_v49  ;;  %v260_v59 = vmax.f32 %v196_v50, 0.0  ;;  %v76_v42 = vld [vmem:[%s896_s0 + $0x1f0] sm:$0xff]  ;;  %v77_v47 = vld [vmem:[%s896_s0 + $0x1f8] sm:$0xff] }
  0x26   :  { %v132_v57 = vmul.f32 %v380_v1, %v61_v45  ;;  %v200_v60 = vadd.f32 %v385_v2, %v129_v51  ;;  %v201_v61 = vadd.f32 %v385_v2, %v130_v52  ;;  %v202_v62 = vadd.f32 %v385_v2, %v131_v53 }
  0x27   :  { %v261_v4 = vmax.f32 %v197_v54, 0.0  ;;  %v262_v5 = vmax.f32 %v198_v55, 0.0  ;;  %v263_v6 = vmax.f32 %v199_v56, 0.0  ;;  %324 = vst [vmem:[%s899_s3 + $0x140] sm:$0xff] %v260_v59  ;;  %v133_v14 = vmul.f32 %v380_v1, %v62_v58 }
  0x28   :  { %v203_v7 = vadd.f32 %v385_v2, %v132_v57  ;;  %v264_v11 = vmax.f32 %v200_v60, 0.0  ;;  %v265_v12 = vmax.f32 %v201_v61, 0.0  ;;  %v266_v13 = vmax.f32 %v202_v62, 0.0 }
  0x29   :  { %325 = vst [vmem:[%s899_s3 + $0x148] sm:$0xff] %v261_v4  ;;  %326 = vst [vmem:[%s899_s3 + $0x150] sm:$0xff] %v262_v5  ;;  %v134_v17 = vmul.f32 %v380_v1, %v63_v63  ;;  %v135_v18 = vmul.f32 %v380_v1, %v64_v0  ;;  %v136_v19 = vmul.f32 %v380_v1, %v65_v3 }
  0x2a   :  { %327 = vst [vmem:[%s899_s3 + $0x158] sm:$0xff] %v263_v6  ;;  %v267_v16 = vmax.f32 %v203_v7, 0.0  ;;  %328 = vst [vmem:[%s899_s3 + $0x160] sm:$0xff] %v264_v11  ;;  %v204_v20 = vadd.f32 %v385_v2, %v133_v14  ;;  %v137_v21 = vmul.f32 %v380_v1, %v66_v8  ;;  %v138_v22 = vmul.f32 %v380_v1, %v67_v9 }
  0x2b   :  { %329 = vst [vmem:[%s899_s3 + $0x168] sm:$0xff] %v265_v12  ;;  %330 = vst [vmem:[%s899_s3 + $0x170] sm:$0xff] %v266_v13  ;;  %v139_v23 = vmul.f32 %v380_v1, %v68_v10  ;;  %v205_v24 = vadd.f32 %v385_v2, %v134_v17  ;;  %v206_v25 = vadd.f32 %v385_v2, %v135_v18 }
  0x2c   :  { %331 = vst [vmem:[%s899_s3 + $0x178] sm:$0xff] %v267_v16  ;;  %v207_v26 = vadd.f32 %v385_v2, %v136_v19  ;;  %v140_v27 = vmul.f32 %v380_v1, %v69_v15  ;;  %v268_v29 = vmax.f32 %v204_v20, 0.0  ;;  %v208_v30 = vadd.f32 %v385_v2, %v137_v21 }
  0x2d   :  { %v209_v31 = vadd.f32 %v385_v2, %v138_v22  ;;  %v210_v32 = vadd.f32 %v385_v2, %v139_v23  ;;  %v269_v36 = vmax.f32 %v205_v24, 0.0  ;;  %v270_v37 = vmax.f32 %v206_v25, 0.0 }
  0x2e   :  { %v271_v38 = vmax.f32 %v207_v26, 0.0  ;;  %v211_v39 = vadd.f32 %v385_v2, %v140_v27  ;;  %332 = vst [vmem:[%s899_s3 + $0x180] sm:$0xff] %v268_v29  ;;  %v272_v43 = vmax.f32 %v208_v30, 0.0  ;;  %v141_v46 = vmul.f32 %v380_v1, %v70_v28 }
  0x2f   :  { %v273_v44 = vmax.f32 %v209_v31, 0.0  ;;  %v274_v45 = vmax.f32 %v210_v32, 0.0  ;;  %333 = vst [vmem:[%s899_s3 + $0x188] sm:$0xff] %v269_v36  ;;  %334 = vst [vmem:[%s899_s3 + $0x190] sm:$0xff] %v270_v37  ;;  %v142_v49 = vmul.f32 %v380_v1, %v71_v33  ;;  %v143_v50 = vmul.f32 %v380_v1, %v72_v34 }
  0x30   :  { %335 = vst [vmem:[%s899_s3 + $0x198] sm:$0xff] %v271_v38  ;;  %v275_v48 = vmax.f32 %v211_v39, 0.0  ;;  %v144_v51 = vmul.f32 %v380_v1, %v73_v35  ;;  %336 = vst [vmem:[%s899_s3 + $0x1a0] sm:$0xff] %v272_v43  ;;  %v212_v52 = vadd.f32 %v385_v2, %v141_v46  ;;  %v145_v53 = vmul.f32 %v380_v1, %v74_v40 }
  0x31   :  { %337 = vst [vmem:[%s899_s3 + $0x1a8] sm:$0xff] %v273_v44  ;;  %338 = vst [vmem:[%s899_s3 + $0x1b0] sm:$0xff] %v274_v45  ;;  %v146_v54 = vmul.f32 %v380_v1, %v75_v41  ;;  %v147_v55 = vmul.f32 %v380_v1, %v76_v42  ;;  %v213_v56 = vadd.f32 %v385_v2, %v142_v49 }
  0x32   :  { %339 = vst [vmem:[%s899_s3 + $0x1b8] sm:$0xff] %v275_v48  ;;  %v214_v57 = vadd.f32 %v385_v2, %v143_v50  ;;  %v215_v58 = vadd.f32 %v385_v2, %v144_v51  ;;  %v148_v59 = vmul.f32 %v380_v1, %v77_v47  ;;  %v276_v60 = vmax.f32 %v212_v52, 0.0 }
  0x33   :  { %v216_v61 = vadd.f32 %v385_v2, %v145_v53  ;;  %v217_v62 = vadd.f32 %v385_v2, %v146_v54  ;;  %v218_v63 = vadd.f32 %v385_v2, %v147_v55  ;;  %v277_v0 = vmax.f32 %v213_v56, 0.0 }
  0x34   :  { %v278_v3 = vmax.f32 %v214_v57, 0.0  ;;  %v279_v4 = vmax.f32 %v215_v58, 0.0  ;;  %v219_v5 = vadd.f32 %v385_v2, %v148_v59  ;;  %340 = vst [vmem:[%s899_s3 + $0x1c0] sm:$0xff] %v276_v60 }
  0x35   :  { %v280_v6 = vmax.f32 %v216_v61, 0.0  ;;  %v281_v7 = vmax.f32 %v217_v62, 0.0  ;;  %v282_v8 = vmax.f32 %v218_v63, 0.0  ;;  %341 = vst [vmem:[%s899_s3 + $0x1c8] sm:$0xff] %v277_v0 }
  0x36   :  { %342 = vst [vmem:[%s899_s3 + $0x1d0] sm:$0xff] %v278_v3  ;;  %343 = vst [vmem:[%s899_s3 + $0x1d8] sm:$0xff] %v279_v4  ;;  %v283_v1 = vmax.f32 %v219_v5, 0.0 }
  0x37   :  { %344 = vst [vmem:[%s899_s3 + $0x1e0] sm:$0xff] %v280_v6  ;;  %345 = vst [vmem:[%s899_s3 + $0x1e8] sm:$0xff] %v281_v7 }
  0x38   :  { %346 = vst [vmem:[%s899_s3 + $0x1f0] sm:$0xff] %v282_v8  ;;  %347 = vst [vmem:[%s899_s3 + $0x1f8] sm:$0xff] %v283_v1 }

// kernel: stem_forward.6
= control target key start
LH: loop header
LB: loop body
LE: loop exit
PB: predicated region body
PF: predicated region fallthrough
CT: control target
= control target key end

     0   :  { %s1279_s15 = smov 0   ;;  %s1281_s16 = smov 0   ;;  %s1466_s0 = inlined_call_operand.vmem [shape: bf16[512,128], index: 0, kind: input, shape index: {}]   ;;  %s1467_s1 = inlined_call_operand.vmem [shape: bf16[128,128], index: 1, kind: input, shape index: {}]   ;;  %s1468_s2 = inlined_call_operand.vmem [shape: f32[1,128], index: 2, kind: input, shape index: {}]   ;;  %s1469_s3 = inlined_call_operand.vmem [shape: f32[1,128], index: 3, kind: input, shape index: {}]   ;;  %s1470_s4 = inlined_call_operand.vmem [shape: f32[512,128], index: 4, kind: output, shape index: {}]  }
   0x1   :  { %s1283_s17 = smov 0  }
   0x2 LB: > { %s33_s18 = sadd.s32 1, %s1248_s16  ;;  %p1061_p0 = scmp.ge.s32.totalorder %s1252_s17, 1  ;;  %s1252_s17 = sphi %s1283_s17, %s14_s17   ;;  %s1248_s16 = sphi %s1281_s16, %s1472_s16   ;;  %s1244_s15 = sphi %s1279_s15, %s1471_s15  }
   0x3   : > { %p35_p1 = scmp.ge.s32.totalorder %s33_s18, 2  ;;  %p221_p2 = scmp.lt.s32.totalorder %s1252_s17, 3 }
   0x5   : > { %s1474_s18 = smov (%p35_p1, %s33_s18), 0  ;;  %p222_p3 = pnand %p1061_p0, %p221_p2 }
   0x6   : > { %s1062_s21 = sshll.u32 (!%p222_p3), %s1244_s15, 5 }
   0x7   : > { %225 = sbr.rel (%p222_p3) target bundleno = 273 (0x111), region = 36  ;;  %p268_p4 = scmp.lt.s32.totalorder (!%p222_p3), %s1062_s21, 63 }
   0xc   : > { %v1206_v0 = vld [vmem:[%s1467_s1 + $0x38] sm:$0xff]   ;;  %v1207_v1 = vld [vmem:[%s1467_s1 + $0x30] sm:$0xff]   ;;  %s1476_s21 = smov (!%p268_p4, %s1062_s21), 63  ;;  %v1208_v2 = vld [vmem:[%s1467_s1 + $0x28] sm:$0xff]  }
   0xd   : > { %1118 = vmatprep.subr.bf16.mxu0 %v1206_v0  ;;  %1166 = vmatprep.subr.bf16.mxu1 %v1206_v0  ;;  %s1063_s26 = sshll.u32 %s1476_s21, 2  ;;  %v1209_v3 = vld [vmem:[%s1467_s1 + $0x20] sm:$0xff]   ;;  %v1210_v6 = vld [vmem:[%s1467_s1 + $0x18] sm:$0xff]   ;;  %v1211_v7 = vld [vmem:[%s1467_s1 + $0x10] sm:$0xff]   ;;  %s1065_s19 = sshll.u32 %s1476_s21, 3 }
   0xe   : > { %1119 = vmatpush3.bf16.msra.mxu0 %v1206_v0  ;;  %1174 = vmatpush3.bf16.msra.mxu1 %v1206_v0  ;;  %s1312_s29 = scalar_lea.vmem %s1466_s0, %s1063_s26  ;;  %v1212_v8 = vld [vmem:[%s1467_s1 + $0x8] sm:$0xff]   ;;  %v1213_v9 = vld [vmem:[%s1467_s1] sm:$0xff]   ;;  %s1361_s25 = scalar_lea.vmem %s1470_s4, %s1065_s19 }
   0xf   : > { %1120 = vmatprep.subr.bf16.mxu0 %v1207_v1  ;;  %1167 = vmatprep.subr.bf16.mxu1 %v1207_v1  ;;  %v1214_v4 = vld [vmem:[%s1312_s29] sm:$0xff]   ;;  %v1216_v10 = vld [vmem:[%s1312_s29 + $0x8] sm:$0xff]   ;;  %v1218_v12 = vld [vmem:[%s1312_s29 + $0x10] sm:$0xff]  }
  0x10   : > { %v1215_v5 = vld [vmem:[%s1312_s29 + $0x40] sm:$0xff]   ;;  %1134 = vmatprep.mubr.bf16.mxu0 %v1214_v4  ;;  %v1217_v11 = vld [vmem:[%s1312_s29 + $0x48] sm:$0xff]   ;;  %v1219_v13 = vld [vmem:[%s1312_s29 + $0x50] sm:$0xff]  }
  0x11   : > { %1150 = vmatprep.mubr.bf16.mxu1 %v1215_v5  ;;  %v1220_v14 = vld [vmem:[%s1312_s29 + $0x18] sm:$0xff]   ;;  %v1222_v16 = vld [vmem:[%s1312_s29 + $0x20] sm:$0xff]   ;;  %v1224_v18 = vld [vmem:[%s1312_s29 + $0x28] sm:$0xff]  }
  0x12   : > { %1121 = vmatpush3.bf16.msra.mxu0 %v1207_v1  ;;  %1175 = vmatpush3.bf16.msra.mxu1 %v1207_v1  ;;  %v1221_v15 = vld [vmem:[%s1312_s29 + $0x58] sm:$0xff]   ;;  %v1223_v17 = vld [vmem:[%s1312_s29 + $0x60] sm:$0xff]   ;;  %v1225_v19 = vld [vmem:[%s1312_s29 + $0x68] sm:$0xff]  }
  0x13   : > { %1122 = vmatprep.subr.bf16.mxu0 %v1208_v2  ;;  %1168 = vmatprep.subr.bf16.mxu1 %v1208_v2  ;;  %v1226_v20 = vld [vmem:[%s1312_s29 + $0x30] sm:$0xff]   ;;  %v1228_v22 = vld [vmem:[%s1312_s29 + $0x38] sm:$0xff]   ;;  %v1348_v24 = vld [vmem:[%s1468_s2] ss:$0 sm:$0xff] }
  0x14   : > { %v1227_v21 = vld [vmem:[%s1312_s29 + $0x70] sm:$0xff]   ;;  %v1229_v23 = vld [vmem:[%s1312_s29 + $0x78] sm:$0xff]   ;;  %v1354_v26 = vld [vmem:[%s1469_s3] ss:$0 sm:$0xff] }
  0x16   : > { %1123 = vmatpush3.bf16.msra.mxu0 %v1208_v2  ;;  %1176 = vmatpush3.bf16.msra.mxu1 %v1208_v2 }
  0x17   : > { %1124 = vmatprep.subr.bf16.mxu0 %v1209_v3  ;;  %1169 = vmatprep.subr.bf16.mxu1 %v1209_v3 }
  0x1a   : > { %1125 = vmatpush3.bf16.msra.mxu0 %v1209_v3  ;;  %1177 = vmatpush3.bf16.msra.mxu1 %v1209_v3 }
  0x1b   : > { %1126 = vmatprep.subr.bf16.mxu0 %v1210_v6  ;;  %1170 = vmatprep.subr.bf16.mxu1 %v1210_v6 }
  0x1e   : > { %1127 = vmatpush3.bf16.msra.mxu0 %v1210_v6  ;;  %1178 = vmatpush3.bf16.msra.mxu1 %v1210_v6 }
  0x1f   : > { %1128 = vmatprep.subr.bf16.mxu0 %v1211_v7  ;;  %1171 = vmatprep.subr.bf16.mxu1 %v1211_v7 }
  0x22   : > { %1129 = vmatpush3.bf16.msra.mxu0 %v1211_v7  ;;  %1179 = vmatpush3.bf16.msra.mxu1 %v1211_v7 }
  0x23   : > { %1130 = vmatprep.subr.bf16.mxu0 %v1212_v8  ;;  %1172 = vmatprep.subr.bf16.mxu1 %v1212_v8 }
  0x26   : > { %1131 = vmatpush3.bf16.msra.mxu0 %v1212_v8  ;;  %1180 = vmatpush3.bf16.msra.mxu1 %v1212_v8 }
  0x27   : > { %1132 = vmatprep.subr.bf16.mxu0 %v1213_v9  ;;  %1173 = vmatprep.subr.bf16.mxu1 %v1213_v9 }
  0x2a   : > { %1133 = vmatpush3.bf16.msra.mxu0 %v1213_v9  ;;  %1181 = vmatpush3.bf16.msra.mxu1 %v1213_v9 }
  0x2d   : > { %1135 = vmatmul.mubr.bf16.vlgmr.msra.gmra.mxu0 %v1216_v10  ;;  %1151 = vmatmul.mubr.bf16.vlgmr.msra.gmra.mxu1 %v1217_v11 }
  0x2e   : > { %1138 = vmatprep.mubr.bf16.mxu0 %v1218_v12  ;;  %1154 = vmatprep.mubr.bf16.mxu1 %v1219_v13 }
  0x35   : > { %1139 = vmatmul.mubr.bf16.gmra.mxu0 %v1220_v14  ;;  %1155 = vmatmul.mubr.bf16.gmra.mxu1 %v1221_v15 }
  0x36   : > { %1142 = vmatprep.mubr.bf16.mxu0 %v1222_v16  ;;  %1158 = vmatprep.mubr.bf16.mxu1 %v1223_v17 }
  0x3d   : > { %1143 = vmatmul.mubr.bf16.gmra.mxu0 %v1224_v18  ;;  %1159 = vmatmul.mubr.bf16.gmra.mxu1 %v1225_v19 }
  0x3e   : > { %1146 = vmatprep.mubr.bf16.mxu0 %v1226_v20  ;;  %1162 = vmatprep.mubr.bf16.mxu1 %v1227_v21 }
  0x45   : > { %1147 = vmatmul.mubr.bf16.gmra.mxu0 %v1228_v22  ;;  %1163 = vmatmul.mubr.bf16.gmra.mxu1 %v1229_v23 }
  0xed   : > { %v1136_v25 = vpop.f32.mrf.mxu0  ;;  %v1152_v27 = vpop.f32.mrf.mxu1 }
  0xee   : > { %v830_v28 = vmul.f32 %v1136_v25, %v1348_v24  ;;  %v846_v29 = vmul.f32 %v1152_v27, %v1348_v24 }
  0xef   : > { %v595_v30 = vpop.f32.mrf.mxu0  ;;  %v659_v31 = vpop.f32.mrf.mxu1 }
  0xf0   : > { %v869_v32 = vadd.f32 %v1354_v26, %v830_v28  ;;  %v885_v33 = vadd.f32 %v1354_v26, %v846_v29  ;;  %v828_v34 = vmul.f32 %v1348_v24, %v595_v30  ;;  %v844_v35 = vmul.f32 %v1348_v24, %v659_v31 }
  0xf1   : > { %v1137_v36 = vpop.f32.mrf.mxu0  ;;  %v1153_v37 = vpop.f32.mrf.mxu1 }
  0xf2   : > { %901 = vst [vmem:[%s1361_s25 + $0x10] sm:$0xff] %v869_v32  ;;  %917 = vst [vmem:[%s1361_s25 + $0x90] sm:$0xff] %v885_v33  ;;  %v867_v38 = vadd.f32 %v1354_v26, %v828_v34  ;;  %v883_v39 = vadd.f32 %v1354_v26, %v844_v35  ;;  %v831_v40 = vmul.f32 %v1137_v36, %v1348_v24 }
  0xf3   : > { %v847_v41 = vmul.f32 %v1153_v37, %v1348_v24  ;;  %v598_v42 = vpop.f32.mrf.mxu0  ;;  %v662_v43 = vpop.f32.mrf.mxu1 }
  0xf4   : > { %899 = vst [vmem:[%s1361_s25] sm:$0xff] %v867_v38  ;;  %915 = vst [vmem:[%s1361_s25 + $0x80] sm:$0xff] %v883_v39  ;;  %v870_v44 = vadd.f32 %v1354_v26, %v831_v40  ;;  %v829_v46 = vmul.f32 %v1348_v24, %v598_v42  ;;  %v845_v47 = vmul.f32 %v1348_v24, %v662_v43 }
  0xf5   : > { %v886_v45 = vadd.f32 %v1354_v26, %v847_v41  ;;  %v1140_v48 = vpop.f32.mrf.mxu0  ;;  %v1156_v49 = vpop.f32.mrf.mxu1 }
  0xf6   : > { %902 = vst [vmem:[%s1361_s25 + $0x18] sm:$0xff] %v870_v44  ;;  %v868_v50 = vadd.f32 %v1354_v26, %v829_v46  ;;  %v884_v51 = vadd.f32 %v1354_v26, %v845_v47  ;;  %v834_v52 = vmul.f32 %v1140_v48, %v1348_v24  ;;  %v850_v53 = vmul.f32 %v1156_v49, %v1348_v24 }
  0xf7   : > { %918 = vst [vmem:[%s1361_s25 + $0x98] sm:$0xff] %v886_v45  ;;  %v611_v54 = vpop.f32.mrf.mxu0  ;;  %v675_v55 = vpop.f32.mrf.mxu1 }
  0xf8   : > { %900 = vst [vmem:[%s1361_s25 + $0x8] sm:$0xff] %v868_v50  ;;  %916 = vst [vmem:[%s1361_s25 + $0x88] sm:$0xff] %v884_v51  ;;  %v873_v56 = vadd.f32 %v1354_v26, %v834_v52  ;;  %v889_v57 = vadd.f32 %v1354_v26, %v850_v53  ;;  %v832_v58 = vmul.f32 %v1348_v24, %v611_v54 }
  0xf9   : > { %v848_v59 = vmul.f32 %v1348_v24, %v675_v55  ;;  %v1141_v60 = vpop.f32.mrf.mxu0  ;;  %v1157_v61 = vpop.f32.mrf.mxu1 }
  0xfa   : > { %905 = vst [vmem:[%s1361_s25 + $0x30] sm:$0xff] %v873_v56  ;;  %921 = vst [vmem:[%s1361_s25 + $0xb0] sm:$0xff] %v889_v57  ;;  %v871_v62 = vadd.f32 %v1354_v26, %v832_v58  ;;  %v835_v0 = vmul.f32 %v1141_v60, %v1348_v24  ;;  %v851_v1 = vmul.f32 %v1157_v61, %v1348_v24 }
  0xfb   : > { %v887_v63 = vadd.f32 %v1354_v26, %v848_v59  ;;  %v614_v2 = vpop.f32.mrf.mxu0  ;;  %v678_v3 = vpop.f32.mrf.mxu1 }
  0xfc   : > { %903 = vst [vmem:[%s1361_s25 + $0x20] sm:$0xff] %v871_v62  ;;  %v874_v4 = vadd.f32 %v1354_v26, %v835_v0  ;;  %v890_v5 = vadd.f32 %v1354_v26, %v851_v1  ;;  %v833_v6 = vmul.f32 %v1348_v24, %v614_v2  ;;  %v849_v7 = vmul.f32 %v1348_v24, %v678_v3 }
  0xfd   : > { %919 = vst [vmem:[%s1361_s25 + $0xa0] sm:$0xff] %v887_v63  ;;  %v1144_v8 = vpop.f32.mrf.mxu0  ;;  %v1160_v9 = vpop.f32.mrf.mxu1 }
  0xfe   : > { %906 = vst [vmem:[%s1361_s25 + $0x38] sm:$0xff] %v874_v4  ;;  %922 = vst [vmem:[%s1361_s25 + $0xb8] sm:$0xff] %v890_v5  ;;  %v872_v10 = vadd.f32 %v1354_v26, %v833_v6  ;;  %v888_v11 = vadd.f32 %v1354_v26, %v849_v7  ;;  %v838_v12 = vmul.f32 %v1144_v8, %v1348_v24 }
  0xff   : > { %v854_v13 = vmul.f32 %v1160_v9, %v1348_v24  ;;  %v627_v14 = vpop.f32.mrf.mxu0  ;;  %v691_v15 = vpop.f32.mrf.mxu1 }
 0x100   : > { %904 = vst [vmem:[%s1361_s25 + $0x28] sm:$0xff] %v872_v10  ;;  %920 = vst [vmem:[%s1361_s25 + $0xa8] sm:$0xff] %v888_v11  ;;  %v877_v16 = vadd.f32 %v1354_v26, %v838_v12  ;;  %v836_v18 = vmul.f32 %v1348_v24, %v627_v14  ;;  %v852_v19 = vmul.f32 %v1348_v24, %v691_v15 }
 0x101   : > { %v893_v17 = vadd.f32 %v1354_v26, %v854_v13  ;;  %v1145_v20 = vpop.f32.mrf.mxu0  ;;  %v1161_v21 = vpop.f32.mrf.mxu1 }
 0x102   : > { %909 = vst [vmem:[%s1361_s25 + $0x50] sm:$0xff] %v877_v16  ;;  %v875_v22 = vadd.f32 %v1354_v26, %v836_v18  ;;  %v891_v23 = vadd.f32 %v1354_v26, %v852_v19  ;;  %v839_v25 = vmul.f32 %v1145_v20, %v1348_v24  ;;  %v855_v27 = vmul.f32 %v1161_v21, %v1348_v24 }
 0x103   : > { %925 = vst [vmem:[%s1361_s25 + $0xd0] sm:$0xff] %v893_v17  ;;  %v630_v28 = vpop.f32.mrf.mxu0  ;;  %v694_v29 = vpop.f32.mrf.mxu1 }
 0x104   : > { %907 = vst [vmem:[%s1361_s25 + $0x40] sm:$0xff] %v875_v22  ;;  %923 = vst [vmem:[%s1361_s25 + $0xc0] sm:$0xff] %v891_v23  ;;  %v878_v30 = vadd.f32 %v1354_v26, %v839_v25  ;;  %v894_v31 = vadd.f32 %v1354_v26, %v855_v27  ;;  %v837_v32 = vmul.f32 %v1348_v24, %v630_v28 }
 0x105   : > { %v853_v33 = vmul.f32 %v1348_v24, %v694_v29  ;;  %v1148_v34 = vpop.f32.mrf.mxu0  ;;  %v1164_v35 = vpop.f32.mrf.mxu1 }
 0x106   : > { %910 = vst [vmem:[%s1361_s25 + $0x58] sm:$0xff] %v878_v30  ;;  %926 = vst [vmem:[%s1361_s25 + $0xd8] sm:$0xff] %v894_v31  ;;  %v876_v36 = vadd.f32 %v1354_v26, %v837_v32  ;;  %v842_v38 = vmul.f32 %v1148_v34, %v1348_v24  ;;  %v858_v39 = vmul.f32 %v1164_v35, %v1348_v24 }
 0x107   : > { %v892_v37 = vadd.f32 %v1354_v26, %v853_v33  ;;  %v643_v40 = vpop.f32.mrf.mxu0  ;;  %v707_v41 = vpop.f32.mrf.mxu1 }
 0x108   : > { %908 = vst [vmem:[%s1361_s25 + $0x48] sm:$0xff] %v876_v36  ;;  %v881_v42 = vadd.f32 %v1354_v26, %v842_v38  ;;  %v897_v43 = vadd.f32 %v1354_v26, %v858_v39  ;;  %v840_v44 = vmul.f32 %v1348_v24, %v643_v40  ;;  %v856_v45 = vmul.f32 %v1348_v24, %v707_v41 }
 0x109   : > { %924 = vst [vmem:[%s1361_s25 + $0xc8] sm:$0xff] %v892_v37  ;;  %v1149_v46 = vpop.f32.mrf.mxu0  ;;  %v1165_v47 = vpop.f32.mrf.mxu1 }
 0x10a   : > { %913 = vst [vmem:[%s1361_s25 + $0x70] sm:$0xff] %v881_v42  ;;  %929 = vst [vmem:[%s1361_s25 + $0xf0] sm:$0xff] %v897_v43  ;;  %v879_v48 = vadd.f32 %v1354_v26, %v840_v44  ;;  %v895_v49 = vadd.f32 %v1354_v26, %v856_v45  ;;  %v843_v50 = vmul.f32 %v1149_v46, %v1348_v24 }
 0x10b   : > { %v859_v51 = vmul.f32 %v1165_v47, %v1348_v24  ;;  %v646_v52 = vpop.f32.mrf.mxu0  ;;  %v710_v53 = vpop.f32.mrf.mxu1 }
 0x10c   : > { %911 = vst [vmem:[%s1361_s25 + $0x60] sm:$0xff] %v879_v48  ;;  %927 = vst [vmem:[%s1361_s25 + $0xe0] sm:$0xff] %v895_v49  ;;  %v882_v54 = vadd.f32 %v1354_v26, %v843_v50  ;;  %v841_v56 = vmul.f32 %v1348_v24, %v646_v52  ;;  %v857_v57 = vmul.f32 %v1348_v24, %v710_v53 }
 0x10d   : > { %v898_v55 = vadd.f32 %v1354_v26, %v859_v51 }
 0x10e   : > { %914 = vst [vmem:[%s1361_s25 + $0x78] sm:$0xff] %v882_v54  ;;  %v880_v58 = vadd.f32 %v1354_v26, %v841_v56  ;;  %v896_v59 = vadd.f32 %v1354_v26, %v857_v57 }
 0x10f   : > { %930 = vst [vmem:[%s1361_s25 + $0xf8] sm:$0xff] %v898_v55 }
 0x110   : > { %912 = vst [vmem:[%s1361_s25 + $0x68] sm:$0xff] %v880_v58  ;;  %928 = vst [vmem:[%s1361_s25 + $0xe8] sm:$0xff] %v896_v59 }
 0x111 PF: > { %s14_s17 = sadd.s32 1, %s1252_s17   ;;  %s1471_s15 = smov %s1248_s16 }
 0x112   : > { %p11_p5 = scmp.ge.s32.totalorder %s14_s17, 4   ;;  %s1472_s16 = smov %s1474_s18 }
 0x114   :  { %13 = sbr.rel (!%p11_p5) target bundleno = 2 (0x2), region = 83 }

// kernel: stem_forward.8
= control target key start
LH: loop header
LB: loop body
LE: loop exit
PB: predicated region body
PF: predicated region fallthrough
CT: control target
= control target key end

     0   :  { %s1996_s15 = smov 0   ;;  %s1998_s16 = smov 0   ;;  %s2299_s0 = inlined_call_operand.vmem [shape: bf16[512,384], index: 0, kind: input, shape index: {}]   ;;  %s2300_s1 = inlined_call_operand.vmem [shape: bf16[384,128], index: 1, kind: input, shape index: {}]   ;;  %s2301_s2 = inlined_call_operand.vmem [shape: f32[1,128], index: 2, kind: input, shape index: {}]   ;;  %s2302_s3 = inlined_call_operand.vmem [shape: f32[1,128], index: 3, kind: input, shape index: {}]   ;;  %s2303_s4 = inlined_call_operand.vmem [shape: f32[512,128], index: 4, kind: output, shape index: {}]  }
   0x1   :  { %s2000_s17 = smov 0  }
   0x2 LB: > { %s33_s18 = sadd.s32 1, %s1965_s16  ;;  %p1553_p0 = scmp.ge.s32.totalorder %s1969_s17, 1  ;;  %s1969_s17 = sphi %s2000_s17, %s14_s17   ;;  %s1965_s16 = sphi %s1998_s16, %s2305_s16   ;;  %s1961_s15 = sphi %s1996_s15, %s2304_s15  }
   0x3   : > { %p35_p1 = scmp.ge.s32.totalorder %s33_s18, 2  ;;  %p224_p2 = scmp.lt.s32.totalorder %s1969_s17, 3 }
   0x5   : > { %s2307_s18 = smov (%p35_p1, %s33_s18), 0  ;;  %p225_p3 = pnand %p1553_p0, %p224_p2 }
   0x6   : > { %s1554_s21 = sshll.u32 (!%p225_p3), %s1961_s15, 5 }
   0x7   : > { %228 = sbr.rel (%p225_p3) target bundleno = 341 (0x155), region = 36  ;;  %p274_p4 = scmp.lt.s32.totalorder (!%p225_p3), %s1554_s21, 63 }
   0xc   : > { %v1859_v0 = vld [vmem:[%s2300_s1 + $0x78] sm:$0xff]   ;;  %v1861_v2 = vld [vmem:[%s2300_s1 + $0x70] sm:$0xff]   ;;  %v1863_v4 = vld [vmem:[%s2300_s1 + $0x68] sm:$0xff]   ;;  %s2309_s21 = smov (!%p274_p4, %s1554_s21), 63 }
   0xd   : > { %v1860_v1 = vld [vmem:[%s2300_s1 + $0x38] sm:$0xff]   ;;  %1634 = vmatprep.subr.bf16.mxu0 %v1859_v0  ;;  %1818 = vmatprep.subr.bf16.mxu1 %v1859_v0  ;;  %v1862_v3 = vld [vmem:[%s2300_s1 + $0x30] sm:$0xff]   ;;  %v1864_v5 = vld [vmem:[%s2300_s1 + $0x28] sm:$0xff]   ;;  %s1834_s8 = smul.u32 12, %s2309_s21  ;;  %s1557_s30 = sshll.u32 %s2309_s21, 3 }
   0xe   : > { %1635 = vmatpush3.bf16.msra.mxu0 %v1860_v1  ;;  %1826 = vmatpush3.bf16.msra.mxu1 %v1860_v1  ;;  %v1865_v6 = vld [vmem:[%s2300_s1 + $0x60] sm:$0xff]   ;;  %v1867_v8 = vld [vmem:[%s2300_s1 + $0x58] sm:$0xff]   ;;  %v1869_v10 = vld [vmem:[%s2300_s1 + $0x50] sm:$0xff]   ;;  %s2177_s9 = scalar_lea.vmem %s2303_s4, %s1557_s30 }
   0xf   : > { %1636 = vmatprep.subr.bf16.mxu0 %v1861_v2  ;;  %1819 = vmatprep.subr.bf16.mxu1 %v1861_v2  ;;  %v1866_v7 = vld [vmem:[%s2300_s1 + $0x20] sm:$0xff]   ;;  %s2047_s15 = scalar_lea.vmem %s2299_s0, %s1834_s8  ;;  %v1868_v9 = vld [vmem:[%s2300_s1 + $0x18] sm:$0xff]   ;;  %v1870_v13 = vld [vmem:[%s2300_s1 + $0x10] sm:$0xff]  }
  0x10   : > { %v1877_v11 = vld [vmem:[%s2047_s15 + $0x4] ss:$12 sps:$4 sm:$0xff]   ;;  %v1871_v14 = vld [vmem:[%s2300_s1 + $0x48] sm:$0xff]   ;;  %v1881_v18 = vld [vmem:[%s2300_s1 + $0xb8] sm:$0xff]  }
  0x11   : > { %v1880_v12 = vld [vmem:[%s2047_s15 + $0x124] ss:$12 sps:$4 sm:$0xff]   ;;  %921 = vmatprep.mubr.bf16.mxu0 %v1877_v11  ;;  %v1872_v15 = vld [vmem:[%s2300_s1 + $0x8] sm:$0xff]   ;;  %v1891_v28 = vld [vmem:[%s2047_s15 + $0x34] ss:$12 sps:$4 sm:$0xff]  }
  0x12   : > { %1637 = vmatpush3.bf16.msra.mxu0 %v1862_v3  ;;  %1827 = vmatpush3.bf16.msra.mxu1 %v1862_v3  ;;  %v1873_v16 = vld [vmem:[%s2300_s1 + $0x40] sm:$0xff]   ;;  %v1883_v21 = vld [vmem:[%s2047_s15 + $0x1c] ss:$12 sps:$4 sm:$0xff]   ;;  %v1882_v22 = vld [vmem:[%s2300_s1 + $0xb0] sm:$0xff]  }
  0x13   : > { %1638 = vmatprep.subr.bf16.mxu0 %v1863_v4  ;;  %1820 = vmatprep.subr.bf16.mxu1 %v1863_v4  ;;  %v1874_v17 = vld [vmem:[%s2300_s1] sm:$0xff]   ;;  %v1885_v23 = vld [vmem:[%s2047_s15 + $0x13c] ss:$12 sps:$4 sm:$0xff]   ;;  %v1898_v33 = vld [vmem:[%s2300_s1 + $0x90] sm:$0xff]  }
  0x14   : > { %1017 = vmatprep.mubr.bf16.mxu1 %v1880_v12  ;;  %v1875_v19 = vld [vmem:[%s2047_s15] ss:$12 sps:$4 sm:$0xff]   ;;  %v1887_v24 = vld [vmem:[%s2047_s15 + $0x18] ss:$12 sps:$4 sm:$0xff]   ;;  %v1895_v31 = vld [vmem:[%s2047_s15 + $0x30] ss:$12 sps:$4 sm:$0xff]  }
  0x15   : > { %v1878_v20 = vld [vmem:[%s2047_s15 + $0x120] ss:$12 sps:$4 sm:$0xff]   ;;  %v1888_v26 = vld [vmem:[%s2047_s15 + $0x138] ss:$12 sps:$4 sm:$0xff]   ;;  %v1896_v32 = vld [vmem:[%s2047_s15 + $0x150] ss:$12 sps:$4 sm:$0xff]  }
  0x16   : > { %1639 = vmatpush3.bf16.msra.mxu0 %v1864_v5  ;;  %1828 = vmatpush3.bf16.msra.mxu1 %v1864_v5  ;;  %v1889_v25 = vld [vmem:[%s2300_s1 + $0xa8] sm:$0xff]   ;;  %v1890_v27 = vld [vmem:[%s2300_s1 + $0xa0] sm:$0xff]   ;;  %v1897_v30 = vld [vmem:[%s2300_s1 + $0x98] sm:$0xff]  }
  0x17   : > { %1640 = vmatprep.subr.bf16.mxu0 %v1865_v6  ;;  %1821 = vmatprep.subr.bf16.mxu1 %v1865_v6  ;;  %v1893_v29 = vld [vmem:[%s2047_s15 + $0x154] ss:$12 sps:$4 sm:$0xff]   ;;  %v1899_v34 = vld [vmem:[%s2047_s15 + $0x4c] ss:$12 sps:$4 sm:$0xff]   ;;  %v1907_v39 = vld [vmem:[%s2047_s15 + $0x64] ss:$12 sps:$4 sm:$0xff]  }
  0x18   : > { %v1901_v35 = vld [vmem:[%s2047_s15 + $0x16c] ss:$12 sps:$4 sm:$0xff]   ;;  %v1903_v37 = vld [vmem:[%s2047_s15 + $0x48] ss:$12 sps:$4 sm:$0xff]   ;;  %v1906_v40 = vld [vmem:[%s2300_s1 + $0x80] sm:$0xff]  }
  0x19   : > { %v1905_v36 = vld [vmem:[%s2300_s1 + $0x88] sm:$0xff]   ;;  %v1914_v45 = vld [vmem:[%s2047_s15 + $0x38] ss:$12 sps:$4 sm:$0xff]   ;;  %v1916_v47 = vld [vmem:[%s2047_s15 + $0x50] ss:$12 sps:$4 sm:$0xff]  }
  0x1a   : > { %1641 = vmatpush3.bf16.msra.mxu0 %v1866_v7  ;;  %1829 = vmatpush3.bf16.msra.mxu1 %v1866_v7  ;;  %v1904_v38 = vld [vmem:[%s2047_s15 + $0x168] ss:$12 sps:$4 sm:$0xff]   ;;  %v1910_v42 = vld [vmem:[%s2047_s15 + $0x60] ss:$12 sps:$4 sm:$0xff]   ;;  %v1915_v46 = vld [vmem:[%s2047_s15 + $0x78] ss:$12 sps:$4 sm:$0xff]  }
  0x1b   : > { %1642 = vmatprep.subr.bf16.mxu0 %v1867_v8  ;;  %1822 = vmatprep.subr.bf16.mxu1 %v1867_v8  ;;  %v1909_v41 = vld [vmem:[%s2047_s15 + $0x8] ss:$12 sps:$4 sm:$0xff]   ;;  %v1911_v43 = vld [vmem:[%s2047_s15 + $0x20] ss:$12 sps:$4 sm:$0xff]   ;;  %v1920_v50 = vld [vmem:[%s2047_s15 + $0x90] ss:$12 sps:$4 sm:$0xff]  }
  0x1c   : > { %v1912_v44 = vld [vmem:[%s2047_s15 + $0x7c] ss:$12 sps:$4 sm:$0xff]   ;;  %v1917_v48 = vld [vmem:[%s2047_s15 + $0x94] ss:$12 sps:$4 sm:$0xff]   ;;  %v1922_v52 = vld [vmem:[%s2047_s15 + $0xac] ss:$12 sps:$4 sm:$0xff]  }
  0x1d   : > { %v1919_v49 = vld [vmem:[%s2047_s15 + $0x68] ss:$12 sps:$4 sm:$0xff]   ;;  %v1921_v51 = vld [vmem:[%s2047_s15 + $0x80] ss:$12 sps:$4 sm:$0xff]   ;;  %v1924_v53 = vld [vmem:[%s2047_s15 + $0x98] ss:$12 sps:$4 sm:$0xff]  }
  0x1e   : > { %1643 = vmatpush3.bf16.msra.mxu0 %v1868_v9  ;;  %1830 = vmatpush3.bf16.msra.mxu1 %v1868_v9  ;;  %v1925_v54 = vld [vmem:[%s2047_s15 + $0xa8] ss:$12 sps:$4 sm:$0xff]   ;;  %v1926_v55 = vld [vmem:[%s2047_s15 + $0xb0] ss:$12 sps:$4 sm:$0xff]   ;;  %v1930_v58 = vld [vmem:[%s2047_s15 + $0xc0] ss:$12 sps:$4 sm:$0xff]  }
  0x1f   : > { %1644 = vmatprep.subr.bf16.mxu0 %v1869_v10  ;;  %1823 = vmatprep.subr.bf16.mxu1 %v1869_v10  ;;  %v1927_v56 = vld [vmem:[%s2047_s15 + $0xc4] ss:$12 sps:$4 sm:$0xff]   ;;  %v1929_v57 = vld [vmem:[%s2047_s15 + $0xc8] ss:$12 sps:$4 sm:$0xff]   ;;  %v1931_v59 = vld [vmem:[%s2047_s15 + $0xe0] ss:$12 sps:$4 sm:$0xff]  }
  0x20   : > { %v1932_v60 = vld [vmem:[%s2047_s15 + $0xdc] ss:$12 sps:$4 sm:$0xff]   ;;  %v1934_v61 = vld [vmem:[%s2047_s15 + $0xf8] ss:$12 sps:$4 sm:$0xff]   ;;  %v1937_v0 = vld [vmem:[%s2047_s15 + $0xf4] ss:$12 sps:$4 sm:$0xff]  }
  0x21   : > { %v1935_v62 = vld [vmem:[%s2047_s15 + $0xd8] ss:$12 sps:$4 sm:$0xff]   ;;  %v1936_v63 = vld [vmem:[%s2047_s15 + $0x110] ss:$12 sps:$4 sm:$0xff]   ;;  %v1939_v1 = vld [vmem:[%s2047_s15 + $0x128] ss:$12 sps:$4 sm:$0xff]  }
  0x22   : > { %1645 = vmatpush3.bf16.msra.mxu0 %v1870_v13  ;;  %1831 = vmatpush3.bf16.msra.mxu1 %v1870_v13  ;;  %v1940_v2 = vld [vmem:[%s2047_s15 + $0xf0] ss:$12 sps:$4 sm:$0xff]   ;;  %v1941_v3 = vld [vmem:[%s2047_s15 + $0x140] ss:$12 sps:$4 sm:$0xff]   ;;  %v1944_v5 = vld [vmem:[%s2047_s15 + $0x158] ss:$12 sps:$4 sm:$0xff]  }
  0x23   : > { %1646 = vmatprep.subr.bf16.mxu0 %v1871_v14  ;;  %1824 = vmatprep.subr.bf16.mxu1 %v1871_v14  ;;  %v1942_v4 = vld [vmem:[%s2047_s15 + $0x10c] ss:$12 sps:$4 sm:$0xff]   ;;  %v1945_v6 = vld [vmem:[%s2047_s15 + $0x108] ss:$12 sps:$4 sm:$0xff]   ;;  %v1946_v7 = vld [vmem:[%s2047_s15 + $0x170] ss:$12 sps:$4 sm:$0xff]  }
  0x26   : > { %1647 = vmatpush3.bf16.msra.mxu0 %v1872_v15  ;;  %1832 = vmatpush3.bf16.msra.mxu1 %v1872_v15 }
  0x27   : > { %1648 = vmatprep.subr.bf16.mxu0 %v1873_v16  ;;  %1825 = vmatprep.subr.bf16.mxu1 %v1873_v16 }
  0x2a   : > { %1649 = vmatpush3.bf16.msra.mxu0 %v1874_v17  ;;  %1833 = vmatpush3.bf16.msra.mxu1 %v1874_v17 }
  0x2b   : > { %1770 = vmatprep.subr.bf16.mxu1 %v1881_v18 }
  0x2d   : > { %922 = vmatmul.mubr.bf16.vlgmr.msra.gmra.mxu0 %v1875_v19  ;;  %1018 = vmatmul.mubr.bf16.vlgmr.msra.gmra.mxu1 %v1878_v20 }
  0x2e   : > { %1771 = vmatpush3.bf16.msra.mxu1 %v1881_v18  ;;  %929 = vmatprep.mubr.bf16.mxu0 %v1883_v21 }
  0x2f   : > { %1772 = vmatprep.subr.bf16.mxu1 %v1882_v22  ;;  %1025 = vmatprep.mubr.bf16.mxu1 %v1885_v23 }
  0x32   : > { %1773 = vmatpush3.bf16.msra.mxu1 %v1882_v22 }
  0x33   : > { %1774 = vmatprep.subr.bf16.mxu1 %v1889_v25 }
  0x35   : > { %930 = vmatmul.mubr.bf16.gmra.mxu0 %v1887_v24  ;;  %1026 = vmatmul.mubr.bf16.gmra.mxu1 %v1888_v26 }
  0x36   : > { %1775 = vmatpush3.bf16.msra.mxu1 %v1889_v25  ;;  %937 = vmatprep.mubr.bf16.mxu0 %v1891_v28 }
  0x37   : > { %1776 = vmatprep.subr.bf16.mxu1 %v1890_v27  ;;  %1033 = vmatprep.mubr.bf16.mxu1 %v1893_v29 }
  0x3a   : > { %1777 = vmatpush3.bf16.msra.mxu1 %v1890_v27 }
  0x3b   : > { %1778 = vmatprep.subr.bf16.mxu1 %v1897_v30 }
  0x3d   : > { %938 = vmatmul.mubr.bf16.gmra.mxu0 %v1895_v31  ;;  %1034 = vmatmul.mubr.bf16.gmra.mxu1 %v1896_v32 }
  0x3e   : > { %1779 = vmatpush3.bf16.msra.mxu1 %v1897_v30  ;;  %945 = vmatprep.mubr.bf16.mxu0 %v1899_v34 }
  0x3f   : > { %1780 = vmatprep.subr.bf16.mxu1 %v1898_v33  ;;  %1041 = vmatprep.mubr.bf16.mxu1 %v1901_v35 }
  0x42   : > { %1781 = vmatpush3.bf16.msra.mxu1 %v1898_v33 }
  0x43   : > { %1782 = vmatprep.subr.bf16.mxu1 %v1905_v36 }
  0x45   : > { %946 = vmatmul.mubr.bf16.gmra.mxu0 %v1903_v37  ;;  %1042 = vmatmul.mubr.bf16.gmra.mxu1 %v1904_v38 }
  0x46   : > { %1783 = vmatpush3.bf16.msra.mxu1 %v1905_v36  ;;  %953 = vmatprep.mubr.bf16.mxu0 %v1907_v39 }
  0x47   : > { %1784 = vmatprep.subr.bf16.mxu1 %v1906_v40  ;;  %1786 = vmatprep.mubr.bf16.mxu1 %v1909_v41 }
  0x4a   : > { %1785 = vmatpush3.bf16.msra.mxu1 %v1906_v40 }
  0x4d   : > { %954 = vmatmul.mubr.bf16.gmra.mxu0 %v1910_v42  ;;  %1787 = vmatmul.mubr.bf16.vlgmr.msra.gmra.mxu1 %v1911_v43 }
  0x4e   : > { %961 = vmatprep.mubr.bf16.mxu0 %v1912_v44  ;;  %1790 = vmatprep.mubr.bf16.mxu1 %v1914_v45 }
  0x55   : > { %962 = vmatmul.mubr.bf16.gmra.mxu0 %v1915_v46  ;;  %1791 = vmatmul.mubr.bf16.gmra.mxu1 %v1916_v47 }
  0x56   : > { %969 = vmatprep.mubr.bf16.mxu0 %v1917_v48  ;;  %1794 = vmatprep.mubr.bf16.mxu1 %v1919_v49  ;;  %v2165_v49 = vld [vmem:[%s2301_s2] ss:$0 sm:$0xff] }
  0x5d   : > { %970 = vmatmul.mubr.bf16.gmra.mxu0 %v1920_v50  ;;  %1795 = vmatmul.mubr.bf16.gmra.mxu1 %v1921_v51 }
  0x5e   : > { %977 = vmatprep.mubr.bf16.mxu0 %v1922_v52  ;;  %1798 = vmatprep.mubr.bf16.mxu1 %v1924_v53  ;;  %v2171_v52 = vld [vmem:[%s2302_s3] ss:$0 sm:$0xff] }
  0x65   : > { %978 = vmatmul.mubr.bf16.gmra.mxu0 %v1925_v54  ;;  %1799 = vmatmul.mubr.bf16.gmra.mxu1 %v1926_v55 }
  0x66   : > { %985 = vmatprep.mubr.bf16.mxu0 %v1927_v56  ;;  %1802 = vmatprep.mubr.bf16.mxu1 %v1929_v57 }
  0x6d   : > { %986 = vmatmul.mubr.bf16.gmra.mxu0 %v1930_v58  ;;  %1803 = vmatmul.mubr.bf16.gmra.mxu1 %v1931_v59 }
  0x6e   : > { %993 = vmatprep.mubr.bf16.mxu0 %v1932_v60  ;;  %1806 = vmatprep.mubr.bf16.mxu1 %v1934_v61 }
  0x75   : > { %994 = vmatmul.mubr.bf16.gmra.mxu0 %v1935_v62  ;;  %1807 = vmatmul.mubr.bf16.gmra.mxu1 %v1936_v63 }
  0x76   : > { %1001 = vmatprep.mubr.bf16.mxu0 %v1937_v0  ;;  %1810 = vmatprep.mubr.bf16.mxu1 %v1939_v1 }
  0x7d   : > { %1002 = vmatmul.mubr.bf16.gmra.mxu0 %v1940_v2  ;;  %1811 = vmatmul.mubr.bf16.gmra.mxu1 %v1941_v3 }
  0x7e   : > { %1009 = vmatprep.mubr.bf16.mxu0 %v1942_v4  ;;  %1814 = vmatprep.mubr.bf16.mxu1 %v1944_v5 }
  0x85   : > { %1010 = vmatmul.mubr.bf16.gmra.mxu0 %v1945_v6  ;;  %1815 = vmatmul.mubr.bf16.gmra.mxu1 %v1946_v7 }
  0xed   : > { %v1650_v8 = vpop.f32.mrf.mxu0  ;;  %v1722_v9 = vpop.f32.mrf.mxu1 }
  0xef   : > { %v1651_v10 = vpop.f32.mrf.mxu0  ;;  %v1723_v11 = vpop.f32.mrf.mxu1 }
  0xf0   : > { %v2142_v12 = vadd.f32 %v1723_v11, %v1722_v9  ;;  %v1652_v50 = vadd.f32 %v1651_v10, %v1650_v8 }
  0xf1   : > { %v1653_v13 = vpop.f32.mrf.mxu0  ;;  %v1725_v14 = vpop.f32.mrf.mxu1 }
  0xf3   : > { %v1654_v15 = vpop.f32.mrf.mxu0  ;;  %v1726_v16 = vpop.f32.mrf.mxu1 }
  0xf4   : > { %v2144_v17 = vadd.f32 %v1726_v16, %v1725_v14  ;;  %v1655_v60 = vadd.f32 %v1654_v15, %v1653_v13 }
  0xf5   : > { %v1656_v18 = vpop.f32.mrf.mxu0  ;;  %v1728_v19 = vpop.f32.mrf.mxu1 }
  0xf7   : > { %v1657_v20 = vpop.f32.mrf.mxu0  ;;  %v1729_v21 = vpop.f32.mrf.mxu1 }
  0xf8   : > { %v2146_v22 = vadd.f32 %v1729_v21, %v1728_v19  ;;  %v1658_v46 = vadd.f32 %v1657_v20, %v1656_v18 }
  0xf9   : > { %v1659_v23 = vpop.f32.mrf.mxu0  ;;  %v1731_v24 = vpop.f32.mrf.mxu1 }
  0xfb   : > { %v1660_v25 = vpop.f32.mrf.mxu0  ;;  %v1732_v26 = vpop.f32.mrf.mxu1 }
  0xfc   : > { %v2148_v27 = vadd.f32 %v1732_v26, %v1731_v24  ;;  %v1661_v55 = vadd.f32 %v1660_v25, %v1659_v23 }
  0xfd   : > { %v1662_v28 = vpop.f32.mrf.mxu0  ;;  %v1734_v29 = vpop.f32.mrf.mxu1 }
  0xff   : > { %v1663_v30 = vpop.f32.mrf.mxu0  ;;  %v1735_v31 = vpop.f32.mrf.mxu1 }
 0x100   : > { %v2150_v32 = vadd.f32 %v1735_v31, %v1734_v29  ;;  %v1664_v8 = vadd.f32 %v1663_v30, %v1662_v28 }
 0x101   : > { %v1665_v33 = vpop.f32.mrf.mxu0  ;;  %v1737_v34 = vpop.f32.mrf.mxu1 }
 0x103   : > { %v1666_v35 = vpop.f32.mrf.mxu0  ;;  %v1738_v36 = vpop.f32.mrf.mxu1 }
 0x104   : > { %v2152_v37 = vadd.f32 %v1738_v36, %v1737_v34  ;;  %v1667_v23 = vadd.f32 %v1666_v35, %v1665_v33 }
 0x105   : > { %v1668_v38 = vpop.f32.mrf.mxu0  ;;  %v2154_v39 = vpop.f32.mrf.mxu1 }
 0x107   : > { %v1669_v40 = vpop.f32.mrf.mxu0  ;;  %v2156_v41 = vpop.f32.mrf.mxu1 }
 0x108   : > { %v1670_v2 = vadd.f32 %v1669_v40, %v1668_v38 }
 0x109   : > { %v1671_v42 = vpop.f32.mrf.mxu0  ;;  %v2158_v43 = vpop.f32.mrf.mxu1 }
 0x10b   : > { %v1672_v44 = vpop.f32.mrf.mxu0  ;;  %v2160_v45 = vpop.f32.mrf.mxu1 }
 0x10c   : > { %v1673_v15 = vadd.f32 %v1672_v44, %v1671_v42 }
 0x10d   : > { %v1674_v47 = vpop.f32.mrf.mxu0  ;;  %v1788_v48 = vpop.f32.mrf.mxu1 }
 0x10e   : > { %v1093_v51 = vadd.f32 %v1788_v48, %v1658_v46 }
 0x10f   : > { %v1675_v53 = vpop.f32.mrf.mxu0  ;;  %v1084_v54 = vpop.f32.mrf.mxu1 }
 0x110   : > { %v1319_v56 = vmul.f32 %v2165_v49, %v1093_v51  ;;  %v1085_v57 = vadd.f32 %v1652_v50, %v1084_v54  ;;  %v1676_v33 = vadd.f32 %v1675_v53, %v1674_v47 }
 0x111   : > { %v1677_v58 = vpop.f32.mrf.mxu0  ;;  %v1789_v59 = vpop.f32.mrf.mxu1 }
 0x112   : > { %v1358_v61 = vadd.f32 %v2171_v52, %v1319_v56  ;;  %v1317_v62 = vmul.f32 %v2165_v49, %v1085_v57  ;;  %v1096_v63 = vadd.f32 %v1789_v59, %v1661_v55 }
 0x113   : > { %v1678_v0 = vpop.f32.mrf.mxu0  ;;  %v1087_v1 = vpop.f32.mrf.mxu1 }
 0x114   : > { %1390 = vst [vmem:[%s2177_s9 + $0x10] sm:$0xff] %v1358_v61  ;;  %v1356_v3 = vadd.f32 %v2171_v52, %v1317_v62  ;;  %v1320_v4 = vmul.f32 %v2165_v49, %v1096_v63  ;;  %v1088_v5 = vadd.f32 %v1655_v60, %v1087_v1  ;;  %v1679_v47 = vadd.f32 %v1678_v0, %v1677_v58 }
 0x115   : > { %v1680_v6 = vpop.f32.mrf.mxu0  ;;  %v1792_v7 = vpop.f32.mrf.mxu1 }
 0x116   : > { %1388 = vst [vmem:[%s2177_s9] sm:$0xff] %v1356_v3  ;;  %v1359_v9 = vadd.f32 %v2171_v52, %v1320_v4  ;;  %v1318_v10 = vmul.f32 %v2165_v49, %v1088_v5  ;;  %v1109_v11 = vadd.f32 %v1792_v7, %v1670_v2 }
 0x117   : > { %v1681_v13 = vpop.f32.mrf.mxu0  ;;  %v1100_v14 = vpop.f32.mrf.mxu1 }
 0x118   : > { %1391 = vst [vmem:[%s2177_s9 + $0x18] sm:$0xff] %v1359_v9  ;;  %v1357_v16 = vadd.f32 %v2171_v52, %v1318_v10  ;;  %v1323_v18 = vmul.f32 %v2165_v49, %v1109_v11  ;;  %v1101_v19 = vadd.f32 %v1664_v8, %v1100_v14  ;;  %v1682_v30 = vadd.f32 %v1681_v13, %v1680_v6 }
 0x119   : > { %v1683_v20 = vpop.f32.mrf.mxu0  ;;  %v1793_v21 = vpop.f32.mrf.mxu1 }
 0x11a   : > { %1389 = vst [vmem:[%s2177_s9 + $0x8] sm:$0xff] %v1357_v16  ;;  %v1362_v24 = vadd.f32 %v2171_v52, %v1323_v18  ;;  %v1321_v25 = vmul.f32 %v2165_v49, %v1101_v19  ;;  %v1112_v26 = vadd.f32 %v1793_v21, %v1673_v15 }
 0x11b   : > { %v1684_v28 = vpop.f32.mrf.mxu0  ;;  %v1103_v29 = vpop.f32.mrf.mxu1 }
 0x11c   : > { %1394 = vst [vmem:[%s2177_s9 + $0x30] sm:$0xff] %v1362_v24  ;;  %v1360_v31 = vadd.f32 %v2171_v52, %v1321_v25  ;;  %v1324_v34 = vmul.f32 %v2165_v49, %v1112_v26  ;;  %v1104_v36 = vadd.f32 %v1667_v23, %v1103_v29  ;;  %v1685_v50 = vadd.f32 %v1684_v28, %v1683_v20 }
 0x11d   : > { %v1686_v38 = vpop.f32.mrf.mxu0  ;;  %v1796_v40 = vpop.f32.mrf.mxu1 }
 0x11e   : > { %1392 = vst [vmem:[%s2177_s9 + $0x20] sm:$0xff] %v1360_v31  ;;  %v1363_v35 = vadd.f32 %v2171_v52, %v1324_v34  ;;  %v1322_v42 = vmul.f32 %v2165_v49, %v1104_v36  ;;  %v1125_v44 = vadd.f32 %v1796_v40, %v1682_v30 }
 0x11f   : > { %v1687_v46 = vpop.f32.mrf.mxu0  ;;  %v1116_v48 = vpop.f32.mrf.mxu1 }
 0x120   : > { %1395 = vst [vmem:[%s2177_s9 + $0x38] sm:$0xff] %v1363_v35  ;;  %v1361_v51 = vadd.f32 %v2171_v52, %v1322_v42  ;;  %v1327_v54 = vmul.f32 %v2165_v49, %v1125_v44  ;;  %v1117_v55 = vadd.f32 %v1676_v33, %v1116_v48  ;;  %v1688_v5 = vadd.f32 %v1687_v46, %v1686_v38 }
 0x121   : > { %v1689_v56 = vpop.f32.mrf.mxu0  ;;  %v1797_v57 = vpop.f32.mrf.mxu1 }
 0x122   : > { %1393 = vst [vmem:[%s2177_s9 + $0x28] sm:$0xff] %v1361_v51  ;;  %v1366_v53 = vadd.f32 %v2171_v52, %v1327_v54  ;;  %v1325_v59 = vmul.f32 %v2165_v49, %v1117_v55  ;;  %v1128_v60 = vadd.f32 %v1797_v57, %v1685_v50 }
 0x123   : > { %v1690_v61 = vpop.f32.mrf.mxu0  ;;  %v1119_v62 = vpop.f32.mrf.mxu1 }
 0x124   : > { %1398 = vst [vmem:[%s2177_s9 + $0x50] sm:$0xff] %v1366_v53  ;;  %v1364_v63 = vadd.f32 %v2171_v52, %v1325_v59  ;;  %v1328_v1 = vmul.f32 %v2165_v49, %v1128_v60  ;;  %v1120_v2 = vadd.f32 %v1679_v47, %v1119_v62  ;;  %v1691_v14 = vadd.f32 %v1690_v61, %v1689_v56 }
 0x125   : > { %v1692_v3 = vpop.f32.mrf.mxu0  ;;  %v1800_v4 = vpop.f32.mrf.mxu1 }
 0x126   : > { %1396 = vst [vmem:[%s2177_s9 + $0x40] sm:$0xff] %v1364_v63  ;;  %v1367_v58 = vadd.f32 %v2171_v52, %v1328_v1  ;;  %v1326_v0 = vmul.f32 %v2165_v49, %v1120_v2 }
 0x127   : > { %v1693_v6 = vpop.f32.mrf.mxu0  ;;  %v1132_v7 = vpop.f32.mrf.mxu1 }
 0x128   : > { %1399 = vst [vmem:[%s2177_s9 + $0x58] sm:$0xff] %v1367_v58  ;;  %v1365_v8 = vadd.f32 %v2171_v52, %v1326_v0  ;;  %v1694_v9 = vadd.f32 %v1693_v6, %v1692_v3  ;;  %v1133_v10 = vadd.f32 %v1688_v5, %v1132_v7 }
 0x129   : > { %v1695_v11 = vpop.f32.mrf.mxu0  ;;  %v1801_v13 = vpop.f32.mrf.mxu1 }
 0x12a   : > { %1397 = vst [vmem:[%s2177_s9 + $0x48] sm:$0xff] %v1365_v8  ;;  %v1141_v15 = vadd.f32 %v1800_v4, %v1694_v9  ;;  %v1329_v16 = vmul.f32 %v2165_v49, %v1133_v10 }
 0x12b   : > { %v1696_v18 = vpop.f32.mrf.mxu0  ;;  %v1135_v19 = vpop.f32.mrf.mxu1 }
 0x12c   : > { %v1331_v20 = vmul.f32 %v2165_v49, %v1141_v15  ;;  %v1368_v21 = vadd.f32 %v2171_v52, %v1329_v16  ;;  %v1697_v23 = vadd.f32 %v1696_v18, %v1695_v11  ;;  %v1136_v24 = vadd.f32 %v1691_v14, %v1135_v19 }
 0x12d   : > { %v1698_v25 = vpop.f32.mrf.mxu0  ;;  %v1804_v26 = vpop.f32.mrf.mxu1 }
 0x12e   : > { %v1370_v28 = vadd.f32 %v2171_v52, %v1331_v20  ;;  %1400 = vst [vmem:[%s2177_s9 + $0x60] sm:$0xff] %v1368_v21  ;;  %v1144_v29 = vadd.f32 %v1801_v13, %v1697_v23  ;;  %v1330_v30 = vmul.f32 %v2165_v49, %v1136_v24  ;;  %v1742_v23 = vadd.f32 %v2156_v41, %v2154_v39 }
 0x12f   : > { %v1699_v31 = vpop.f32.mrf.mxu0  ;;  %v1148_v34 = vpop.f32.mrf.mxu1 }
 0x130   : > { %1402 = vst [vmem:[%s2177_s9 + $0x70] sm:$0xff] %v1370_v28  ;;  %v1332_v36 = vmul.f32 %v2165_v49, %v1144_v29  ;;  %v1369_v38 = vadd.f32 %v2171_v52, %v1330_v30  ;;  %v1700_v40 = vadd.f32 %v1699_v31, %v1698_v25 }
 0x131   : > { %v1701_v33 = vpop.f32.mrf.mxu0  ;;  %v1805_v35 = vpop.f32.mrf.mxu1 }
 0x132   : > { %v1371_v42 = vadd.f32 %v2171_v52, %v1332_v36  ;;  %1401 = vst [vmem:[%s2177_s9 + $0x68] sm:$0xff] %v1369_v38  ;;  %v1149_v44 = vadd.f32 %v1700_v40, %v1148_v34  ;;  %v1745_v40 = vadd.f32 %v2160_v45, %v2158_v43 }
 0x133   : > { %v1702_v46 = vpop.f32.mrf.mxu0  ;;  %v1151_v48 = vpop.f32.mrf.mxu1 }
 0x134   : > { %1403 = vst [vmem:[%s2177_s9 + $0x78] sm:$0xff] %v1371_v42  ;;  %v1333_v50 = vmul.f32 %v2165_v49, %v1149_v44  ;;  %v1703_v51 = vadd.f32 %v1702_v46, %v1701_v33 }
 0x135   : > { %v1704_v54 = vpop.f32.mrf.mxu0  ;;  %v2227_v55 = vpop.f32.mrf.mxu1 }
 0x136   : > { %v1372_v56 = vadd.f32 %v2171_v52, %v1333_v50  ;;  %v1152_v57 = vadd.f32 %v1703_v51, %v1151_v48 }
 0x137   : > { %v1705_v47 = vpop.f32.mrf.mxu0  ;;  %v1164_v53 = vpop.f32.mrf.mxu1 }
 0x138   : > { %1404 = vst [vmem:[%s2177_s9 + $0x80] sm:$0xff] %v1372_v56  ;;  %v1334_v59 = vmul.f32 %v2165_v49, %v1152_v57  ;;  %v1706_v60 = vadd.f32 %v1705_v47, %v1704_v54 }
 0x139   : > { %v1707_v61 = vpop.f32.mrf.mxu0  ;;  %v2232_v62 = vpop.f32.mrf.mxu1 }
 0x13a   : > { %v1373_v63 = vadd.f32 %v2171_v52, %v1334_v59  ;;  %v1157_v1 = vadd.f32 %v1804_v26, %v1706_v60 }
 0x13b   : > { %v1708_v2 = vpop.f32.mrf.mxu0  ;;  %v1167_v3 = vpop.f32.mrf.mxu1 }
 0x13c   : > { %1405 = vst [vmem:[%s2177_s9 + $0x88] sm:$0xff] %v1373_v63  ;;  %v1335_v4 = vmul.f32 %v2165_v49, %v1157_v1  ;;  %v1709_v5 = vadd.f32 %v1708_v2, %v1707_v61 }
 0x13d   : > { %v1710_v58 = vpop.f32.mrf.mxu0  ;;  %v1812_v0 = vpop.f32.mrf.mxu1 }
 0x13e   : > { %v1374_v6 = vadd.f32 %v2171_v52, %v1335_v4  ;;  %v1160_v7 = vadd.f32 %v1805_v35, %v1709_v5  ;;  %v1189_v8 = vadd.f32 %v1812_v0, %v2146_v22 }
 0x13f   : > { %v1711_v9 = vpop.f32.mrf.mxu0  ;;  %v1180_v10 = vpop.f32.mrf.mxu1 }
 0x140   : > { %1406 = vst [vmem:[%s2177_s9 + $0x90] sm:$0xff] %v1374_v6  ;;  %v1336_v11 = vmul.f32 %v2165_v49, %v1160_v7  ;;  %v1343_v13 = vmul.f32 %v2165_v49, %v1189_v8  ;;  %v1712_v14 = vadd.f32 %v1711_v9, %v1710_v58  ;;  %v1181_v15 = vadd.f32 %v2142_v12, %v1180_v10 }
 0x141   : > { %v1713_v16 = vpop.f32.mrf.mxu0  ;;  %v1813_v18 = vpop.f32.mrf.mxu1 }
 0x142   : > { %v1375_v19 = vadd.f32 %v2171_v52, %v1336_v11  ;;  %v1382_v20 = vadd.f32 %v2171_v52, %v1343_v13  ;;  %v1165_v21 = vadd.f32 %v1712_v14, %v1164_v53  ;;  %v1341_v22 = vmul.f32 %v2165_v49, %v1181_v15 }
 0x143   : > { %v1192_v24 = vadd.f32 %v1813_v18, %v2148_v27  ;;  %v1714_v25 = vpop.f32.mrf.mxu0  ;;  %v1183_v26 = vpop.f32.mrf.mxu1 }
 0x144   : > { %1407 = vst [vmem:[%s2177_s9 + $0x98] sm:$0xff] %v1375_v19  ;;  %1414 = vst [vmem:[%s2177_s9 + $0xd0] sm:$0xff] %v1382_v20  ;;  %v1337_v12 = vmul.f32 %v2165_v49, %v1165_v21  ;;  %v1380_v28 = vadd.f32 %v2171_v52, %v1341_v22  ;;  %v1715_v29 = vadd.f32 %v1714_v25, %v1713_v16 }
 0x145   : > { %v1184_v30 = vadd.f32 %v2144_v17, %v1183_v26  ;;  %v1344_v31 = vmul.f32 %v2165_v49, %v1192_v24  ;;  %v1716_v34 = vpop.f32.mrf.mxu0  ;;  %v1816_v36 = vpop.f32.mrf.mxu1 }
 0x146   : > { %v1376_v39 = vadd.f32 %v2171_v52, %v1337_v12  ;;  %1412 = vst [vmem:[%s2177_s9 + $0xc0] sm:$0xff] %v1380_v28  ;;  %v1168_v27 = vadd.f32 %v1715_v29, %v1167_v3  ;;  %v1205_v38 = vadd.f32 %v1816_v36, %v1742_v23 }
 0x147   : > { %v1342_v41 = vmul.f32 %v2165_v49, %v1184_v30  ;;  %v1383_v33 = vadd.f32 %v2171_v52, %v1344_v31  ;;  %v1717_v35 = vpop.f32.mrf.mxu0  ;;  %v1196_v17 = vpop.f32.mrf.mxu1 }
 0x148   : > { %1408 = vst [vmem:[%s2177_s9 + $0xa0] sm:$0xff] %v1376_v39  ;;  %v1338_v42 = vmul.f32 %v2165_v49, %v1168_v27  ;;  %v1347_v46 = vmul.f32 %v2165_v49, %v1205_v38  ;;  %v1718_v48 = vadd.f32 %v1717_v35, %v1716_v34  ;;  %v1197_v50 = vadd.f32 %v2150_v32, %v1196_v17 }
 0x149   : > { %v1381_v44 = vadd.f32 %v2171_v52, %v1342_v41  ;;  %1415 = vst [vmem:[%s2177_s9 + $0xd8] sm:$0xff] %v1383_v33  ;;  %v1719_v51 = vpop.f32.mrf.mxu0  ;;  %v1817_v54 = vpop.f32.mrf.mxu1 }
 0x14a   : > { %v1377_v43 = vadd.f32 %v2171_v52, %v1338_v42  ;;  %v1386_v45 = vadd.f32 %v2171_v52, %v1347_v46  ;;  %v1173_v56 = vadd.f32 %v2227_v55, %v1718_v48  ;;  %v1208_v57 = vadd.f32 %v1817_v54, %v1745_v40 }
 0x14b   : > { %1413 = vst [vmem:[%s2177_s9 + $0xc8] sm:$0xff] %v1381_v44  ;;  %v1345_v47 = vmul.f32 %v2165_v49, %v1197_v50  ;;  %v1720_v53 = vpop.f32.mrf.mxu0  ;;  %v1199_v59 = vpop.f32.mrf.mxu1 }
 0x14c   : > { %1409 = vst [vmem:[%s2177_s9 + $0xa8] sm:$0xff] %v1377_v43  ;;  %1418 = vst [vmem:[%s2177_s9 + $0xf0] sm:$0xff] %v1386_v45  ;;  %v1339_v32 = vmul.f32 %v2165_v49, %v1173_v56  ;;  %v1348_v60 = vmul.f32 %v2165_v49, %v1208_v57  ;;  %v1721_v61 = vadd.f32 %v1720_v53, %v1719_v51 }
 0x14d   : > { %v1200_v63 = vadd.f32 %v2152_v37, %v1199_v59  ;;  %v1384_v55 = vadd.f32 %v2171_v52, %v1345_v47 }
 0x14e   : > { %v1378_v1 = vadd.f32 %v2171_v52, %v1339_v32  ;;  %v1387_v2 = vadd.f32 %v2171_v52, %v1348_v60  ;;  %v1176_v3 = vadd.f32 %v2232_v62, %v1721_v61 }
 0x14f   : > { %v1346_v4 = vmul.f32 %v2165_v49, %v1200_v63  ;;  %1416 = vst [vmem:[%s2177_s9 + $0xe0] sm:$0xff] %v1384_v55 }
 0x150   : > { %1410 = vst [vmem:[%s2177_s9 + $0xb0] sm:$0xff] %v1378_v1  ;;  %1419 = vst [vmem:[%s2177_s9 + $0xf8] sm:$0xff] %v1387_v2  ;;  %v1340_v5 = vmul.f32 %v2165_v49, %v1176_v3 }
 0x151   : > { %v1385_v58 = vadd.f32 %v2171_v52, %v1346_v4 }
 0x152   : > { %v1379_v0 = vadd.f32 %v2171_v52, %v1340_v5 }
 0x153   : > { %1417 = vst [vmem:[%s2177_s9 + $0xe8] sm:$0xff] %v1385_v58 }
 0x154   : > { %1411 = vst [vmem:[%s2177_s9 + $0xb8] sm:$0xff] %v1379_v0 }
 0x155 PF: > { %s14_s17 = sadd.s32 1, %s1969_s17   ;;  %s2304_s15 = smov %s1965_s16 }
 0x156   : > { %p11_p5 = scmp.ge.s32.totalorder %s14_s17, 4   ;;  %s2305_s16 = smov %s2307_s18 }
 0x158   :  { %13 = sbr.rel (!%p11_p5) target bundleno = 2 (0x2), region = 83 }

</bundles_post_ra>
